<compile_context>
chip_gen: v7x
topology: tpu7x:2x2x1
jax: 0.10.0
libtpu: 0.0.40
codegen_flags: <defaults>
</compile_context>

<pallas_src>
import functools

import jax
import jax.numpy as jnp
from jax.experimental import pallas as pl
from jax.experimental.pallas import tpu as pltpu

IN_FEATURES = 2048
HIDDEN = 512
NUM_CLASSES = 102
PADDED_CLASSES = 128  # lane-dense output width
NEG_BIG = -1e30       # padded-class bias: never wins max, exp() underflows to 0


def _round_up(x, m):
    return ((x + m - 1) // m) * m


def classifier_head_kernel(x_ref, w1_ref, b1_ref, w2_ref, b2_ref, o_ref):
    # fc1: cast the f32 x tile to bf16 in-kernel (idle VPU slot under the
    # MXU), bf16 x bf16 MXU matmul with f32 accumulation, + bias, ReLU.
    # Dropout(0.2) is identity in eval mode.
    x_bf = x_ref[...].astype(jnp.bfloat16)
    h = jnp.dot(x_bf, w1_ref[...], preferred_element_type=jnp.float32)
    h = jnp.maximum(h + b1_ref[...], 0.0)

    # fc2: bf16 x bf16 MXU matmul (f32 accumulation); bias add in f32.
    logits = jnp.dot(h.astype(jnp.bfloat16), w2_ref[...],
                     preferred_element_type=jnp.float32)
    logits = logits + b2_ref[...]

    # Numerically stable LogSoftmax over the lane (class) axis.  Padded class
    # lanes carry a -1e30 f32 bias: they never win the max and their exp()
    # underflows to 0 in the sum.
    m = jnp.max(logits, axis=-1, keepdims=True)
    shifted = logits - m
    lse = jnp.log(jnp.sum(jnp.exp(shifted), axis=-1, keepdims=True))
    o_ref[...] = (shifted - lse).astype(o_ref.dtype)


def prepare_weights(w1, b1, w2, b2):
    """One-time (init-time) weight formatting — keep OUT of the per-call path.

    w1: [2048, H] f32 -> bf16
    b1: [1, H]    f32 (unchanged, reshaped to a row)
    w2: [H, 102]  f32 -> zero-padded to [H, 128], bf16
    b2: [1, 102]  f32 -> padded with -1e30 to [1, 128], f32
    """
    H, C = w2.shape
    w1_bf = w1.astype(jnp.bfloat16)
    b1_f = jnp.asarray(b1, jnp.float32).reshape(1, -1)
    w2_p = jnp.zeros((H, PADDED_CLASSES), jnp.bfloat16).at[:, :C].set(
        w2.astype(jnp.bfloat16))
    b2_p = jnp.full((1, PADDED_CLASSES), NEG_BIG, jnp.float32).at[:, :C].set(
        jnp.asarray(b2, jnp.float32).reshape(1, -1))
    return w1_bf, b1_f, w2_p, b2_p


@functools.partial(jax.jit, static_argnames=("tm",))
def classifier_head(x, w1_bf, b1, w2_p, b2_p, *, tm=512):
    """x: [B, 2048] f32; pre-formatted weights from `prepare_weights`.
    Returns [B, 102] f32 log-probabilities."""
    B, F = x.shape
    H = w1_bf.shape[1]

    # Batch tiling: TM=512 for large batches (mem-bound roofline sweet spot),
    # shrink to the 8-padded batch for tiny B (f32 tiles only need 8 sublanes).
    tm_eff = max(8, min(tm, _round_up(B, 8)))
    # v7x megacore: for x-dominated batches keep the "parallel" grid at >= 2
    # steps so both TensorCores get work (skip for small B, where duplicating
    # the resident weights per core would dominate traffic).
    if B >= 1024 and _round_up(B, tm_eff) // tm_eff < 2:
        tm_eff = max(8, _round_up((B + 1) // 2, 8))
    b_pad = _round_up(B, tm_eff)
    if b_pad != B:
        x = jnp.pad(x, ((0, b_pad - B), (0, 0)))
    grid = (b_pad // tm_eff,)

    def _resident(shape):
        # Grid-invariant operand: constant index_map keeps it VMEM-resident
        # across all grid steps; a single buffer suffices.
        return pl.BlockSpec(shape, lambda i: (0, 0),
                            pipeline_mode=pl.Buffered(1))

    out = pl.pallas_call(
        classifier_head_kernel,
        out_shape=jax.ShapeDtypeStruct((b_pad, PADDED_CLASSES), jnp.float32),
        grid_spec=pltpu.PrefetchScalarGridSpec(
            num_scalar_prefetch=0,
            grid=grid,
            in_specs=[
                pl.BlockSpec((tm_eff, F), lambda i: (i, 0)),  # x tile (f32)
                _resident((F, H)),                            # w1 (bf16)
                _resident((1, H)),                            # b1 (f32)
                _resident((H, PADDED_CLASSES)),               # w2 padded (bf16)
                _resident((1, PADDED_CLASSES)),               # b2 padded (f32)
            ],
            out_specs=pl.BlockSpec((tm_eff, PADDED_CLASSES), lambda i: (i, 0)),
        ),
        compiler_params=pltpu.CompilerParams(
            dimension_semantics=("parallel",),  # megacore-shardable on v7x
        ),
    )(x, w1_bf, b1, w2_p, b2_p)

    # Consumers that accept the lane-dense padded 128-wide log-probs (padded
    # lanes ~= -1e30) can skip this slice; kept to match the module's [B, 102]
    # output contract.
    return out[:B, :NUM_CLASSES]


def init_linear(key, fan_in, fan_out):
    """Deterministic init mimicking torch nn.Linear (uniform +-1/sqrt(fan_in)).
    Weight already transposed to [in, out]; bias as [1, out]."""
    kw, kb = jax.random.split(key)
    bound = 1.0 / jnp.sqrt(jnp.float32(fan_in))
    w = jax.random.uniform(kw, (fan_in, fan_out), jnp.float32, -bound, bound)
    b = jax.random.uniform(kb, (1, fan_out), jnp.float32, -bound, bound)
    return w, b


def reference_head_f32(x, w1, b1, w2, b2):
    h = jnp.maximum(x @ w1 + b1, 0.0)
    logits = h @ w2 + b2
    return jax.nn.log_softmax(logits, axis=1)


def reference_head_bf16(x, w1, b1, w2, b2):
    # Same bf16 operand rounding as the kernel (f32 accumulation / bias /
    # softmax) so the tight check isolates MXU accumulation-order differences.
    h = jnp.dot(x.astype(jnp.bfloat16), w1.astype(jnp.bfloat16),
                preferred_element_type=jnp.float32) + b1
    h = jnp.maximum(h, 0.0)
    logits = jnp.dot(h.astype(jnp.bfloat16), w2.astype(jnp.bfloat16),
                     preferred_element_type=jnp.float32) + b2
    return jax.nn.log_softmax(logits, axis=1)


if __name__ == "__main__":
    key = jax.random.PRNGKey(0)
    k_x, k_fc1, k_fc2 = jax.random.split(key, 3)

    B = 8  # small batch; feature width 2048 is fixed by the resnet152 head
    x = jax.random.normal(k_x, (B, IN_FEATURES), jnp.float32)
    w1, b1 = init_linear(k_fc1, IN_FEATURES, HIDDEN)
    w2, b2 = init_linear(k_fc2, HIDDEN, NUM_CLASSES)

    # One-time weight prep (bf16 cast + lane-dense class padding), outside the
    # per-call path.
    w1_bf, b1_f, w2_p, b2_p = prepare_weights(w1, b1, w2, b2)

    out = classifier_head(x, w1_bf, b1_f, w2_p, b2_p)
    out = jax.block_until_ready(out)
    assert out.shape == (B, NUM_CLASSES)

    # Tight check against a reference with identical bf16 operand rounding.
    ref_bf = reference_head_bf16(x, w1, b1, w2, b2)
    assert jnp.allclose(out, ref_bf, atol=5e-3, rtol=5e-3), (
        float(jnp.max(jnp.abs(out - ref_bf))))

    # Looser sanity check against the pure-f32 module semantics.
    ref_f32 = reference_head_f32(x, w1, b1, w2, b2)
    assert jnp.allclose(out, ref_f32, atol=5e-2, rtol=5e-2), (
        float(jnp.max(jnp.abs(out - ref_f32))))

    print("KERNEL_OK")
</pallas_src>

<mosaic_0001>
module attributes {stable_mosaic.version = 11 : i64} {
  func.func @classifier_head_kernel(%arg0: i32, %arg1: memref<8x2048xf32, #tpu.memory_space<vmem>>, %arg2: memref<2048x512xbf16, #tpu.memory_space<vmem>>, %arg3: memref<1x512xf32, #tpu.memory_space<vmem>>, %arg4: memref<512x128xbf16, #tpu.memory_space<vmem>>, %arg5: memref<1x128xf32, #tpu.memory_space<vmem>>, %arg6: memref<8x128xf32, #tpu.memory_space<vmem>>) attributes {dimension_semantics = [#tpu.dimension_semantics<parallel>], iteration_bounds = array<i64: 1>, scalar_prefetch = 0 : i64, scratch_operands = 0 : i64, tpu.core_type = #tpu.core_type<tc>, window_params = [{transform_indices = @transform_0, window_bounds = array<i64: 8, 2048>}, {pipeline_mode = #tpu.pipeline_mode<synchronous>, transform_indices = @transform_1, window_bounds = array<i64: 2048, 512>}, {pipeline_mode = #tpu.pipeline_mode<synchronous>, transform_indices = @transform_2, window_bounds = array<i64: 1, 512>}, {pipeline_mode = #tpu.pipeline_mode<synchronous>, transform_indices = @transform_3, window_bounds = array<i64: 512, 128>}, {pipeline_mode = #tpu.pipeline_mode<synchronous>, transform_indices = @transform_4, window_bounds = array<i64: 1, 128>}, {transform_indices = @transform_5, window_bounds = array<i64: 8, 128>}]} {
    %c0 = arith.constant 0 : index
    %c0_0 = arith.constant 0 : index
    %0 = vector.load %arg1[%c0, %c0_0] : memref<8x2048xf32, #tpu.memory_space<vmem>>, vector<8x2048xf32>
    %1 = arith.truncf %0 : vector<8x2048xf32> to vector<8x2048xbf16>
    %c0_1 = arith.constant 0 : index
    %c0_2 = arith.constant 0 : index
    %2 = vector.load %arg2[%c0_1, %c0_2] : memref<2048x512xbf16, #tpu.memory_space<vmem>>, vector<2048x512xbf16>
    %cst = arith.constant dense<0.000000e+00> : vector<8x512xf32>
    %3 = tpu.matmul %1, %2, %cst {dimension_numbers = #tpu.dot_dimension_numbers<[1], [0], [0], [1], [0, 0, 1, 1], [], []>} : vector<8x2048xbf16>, vector<2048x512xbf16>, vector<8x512xf32> -> vector<8x512xf32>
    %c0_3 = arith.constant 0 : index
    %c0_4 = arith.constant 0 : index
    %4 = vector.load %arg3[%c0_3, %c0_4] : memref<1x512xf32, #tpu.memory_space<vmem>>, vector<1x512xf32>
    %5 = vector.broadcast %4 : vector<1x512xf32> to vector<8x512xf32>
    %6 = arith.addf %3, %5 : vector<8x512xf32>
    %cst_5 = arith.constant 0.000000e+00 : f32
    %7 = vector.broadcast %cst_5 : f32 to vector<8x512xf32>
    %8 = arith.maximumf %6, %7 : vector<8x512xf32>
    %9 = arith.truncf %8 : vector<8x512xf32> to vector<8x512xbf16>
    %c0_6 = arith.constant 0 : index
    %c0_7 = arith.constant 0 : index
    %10 = vector.load %arg4[%c0_6, %c0_7] : memref<512x128xbf16, #tpu.memory_space<vmem>>, vector<512x128xbf16>
    %cst_8 = arith.constant dense<0.000000e+00> : vector<8x128xf32>
    %11 = tpu.matmul %9, %10, %cst_8 {dimension_numbers = #tpu.dot_dimension_numbers<[1], [0], [0], [1], [0, 0, 1, 1], [], []>} : vector<8x512xbf16>, vector<512x128xbf16>, vector<8x128xf32> -> vector<8x128xf32>
    %c0_9 = arith.constant 0 : index
    %c0_10 = arith.constant 0 : index
    %12 = vector.load %arg5[%c0_9, %c0_10] : memref<1x128xf32, #tpu.memory_space<vmem>>, vector<1x128xf32>
    %13 = vector.broadcast %12 : vector<1x128xf32> to vector<8x128xf32>
    %14 = arith.addf %11, %13 : vector<8x128xf32>
    %cst_11 = arith.constant dense<0xFF800000> : vector<8xf32>
    %15 = vector.multi_reduction <maximumf>, %14, %cst_11 [1] : vector<8x128xf32> to vector<8xf32>
    %16 = vector.shape_cast %15 : vector<8xf32> to vector<8x1xf32>
    %17 = vector.broadcast %16 : vector<8x1xf32> to vector<8x128xf32>
    %18 = arith.subf %14, %17 : vector<8x128xf32>
    %19 = math.exp %18 : vector<8x128xf32>
    %cst_12 = arith.constant dense<0.000000e+00> : vector<8xf32>
    %20 = vector.multi_reduction <add>, %19, %cst_12 [1] : vector<8x128xf32> to vector<8xf32>
    %21 = vector.shape_cast %20 : vector<8xf32> to vector<8x1xf32>
    %22 = math.log %21 : vector<8x1xf32>
    %23 = vector.broadcast %22 : vector<8x1xf32> to vector<8x128xf32>
    %24 = arith.subf %18, %23 : vector<8x128xf32>
    %c0_13 = arith.constant 0 : index
    %c0_14 = arith.constant 0 : index
    %25 = vector.load %arg6[%c0_13, %c0_14] : memref<8x128xf32, #tpu.memory_space<vmem>>, vector<8x128xf32>
    tpu.vector_store %arg6[%c0_13, %c0_14], %24 {strides = array<i32>} : memref<8x128xf32, #tpu.memory_space<vmem>>, vector<8x128xf32>,
    return
  }
  func.func @transform_0(%arg0: i32) -> (i32, i32) {
    %c0_i32 = arith.constant 0 : i32
    %c0_i32_0 = arith.constant 0 : i32
    return %arg0, %c0_i32 : i32, i32
  }
  func.func @transform_1(%arg0: i32) -> (i32, i32) {
    %c0_i32 = arith.constant 0 : i32
    %c0_i32_0 = arith.constant 0 : i32
    %c0_i32_1 = arith.constant 0 : i32
    return %c0_i32, %c0_i32_0 : i32, i32
  }
  func.func @transform_2(%arg0: i32) -> (i32, i32) {
    %c0_i32 = arith.constant 0 : i32
    %c0_i32_0 = arith.constant 0 : i32
    %c0_i32_1 = arith.constant 0 : i32
    return %c0_i32, %c0_i32_0 : i32, i32
  }
  func.func @transform_3(%arg0: i32) -> (i32, i32) {
    %c0_i32 = arith.constant 0 : i32
    %c0_i32_0 = arith.constant 0 : i32
    %c0_i32_1 = arith.constant 0 : i32
    return %c0_i32, %c0_i32_0 : i32, i32
  }
  func.func @transform_4(%arg0: i32) -> (i32, i32) {
    %c0_i32 = arith.constant 0 : i32
    %c0_i32_0 = arith.constant 0 : i32
    %c0_i32_1 = arith.constant 0 : i32
    return %c0_i32, %c0_i32_0 : i32, i32
  }
  func.func @transform_5(%arg0: i32) -> (i32, i32) {
    %c0_i32 = arith.constant 0 : i32
    %c0_i32_0 = arith.constant 0 : i32
    return %arg0, %c0_i32 : i32, i32
  }
}

</mosaic_0001>

<bundles_post_ra>
// kernel: classifier_head.1
= control target key start
LH: loop header
LB: loop body
LE: loop exit
PB: predicated region body
PF: predicated region fallthrough
CT: control target
= control target key end

     0   :  { %10 = vsyncpa [#allocation3], 0  ;;  %s5960_s0 = inlined_call_operand.hbm [shape: f32[8,2048], index: 0, kind: input, shape index: {}]   ;;  %s5961_s1 = inlined_call_operand.hbm [shape: bf16[2048,512], index: 1, kind: input, shape index: {}]   ;;  %s5962_s2 = inlined_call_operand.hbm [shape: f32[1,512], index: 2, kind: input, shape index: {}]   ;;  %s5963_s3 = inlined_call_operand.hbm [shape: bf16[512,128], index: 3, kind: input, shape index: {}]   ;;  %s5964_s4 = inlined_call_operand.hbm [shape: f32[1,128], index: 4, kind: input, shape index: {}]   ;;  %s5965_s5 = inlined_call_operand.hbm [shape: f32[8,128], index: 5, kind: output, shape index: {}]  }
   0x1   :  { %11 = vsyncpa [#allocation6], 0 }
   0x2   :  { %12 = vsyncpa [#allocation9], 0 }
   0x3   :  { %13 = vsyncpa [#allocation4], 0  ;;  %s5848_s18 = smov [#allocation5]   ;;  %s5708_s22 = scalar_lea.hbm %s5961_s1, 65536 }
   0x4   :  { %s29_s19 = sshll.u32 %s5848_s18, 4  ;;  %p5709_p0 = scmp.ne.s32.totalorder %s5961_s1, %s5708_s22  ;;  %s30_s19 = int_to_ptr.vmem [resolvable:$true] %s29_s19 }
   0x5   :  { %p5712_p1 = scmp.lt.u32.totalorder %s5708_s22, %s5961_s1 }
   0x7   :  { %p5714_p2 = pnand %p5712_p1, %p5709_p0 }
   0x9   :  { %5717 = shalt.err (!%p5714_p2)
}
   0xa   :  { %s5718_s27 = scalar_lea.vmem %s30_s19, 65536  ;;  %p5723_p4 = scmp.lt.s32.totalorder %s30_s19, %s30_s19 }
   0xb   :  { %p5719_p3 = scmp.ne.s32.totalorder %s30_s19, %s5718_s27  ;;  %p5724_p5 = scmp.lt.s32.totalorder %s5718_s27, %s5718_s27 }
   0xd   :  { %p5725_p6 = por %p5724_p5, %p5723_p4 }
   0xf   :  { %p5726_p7 = pnand %p5725_p6, %p5719_p3 }
  0x11   :  { %5729 = shalt.err (!%p5726_p7)
}
  0x12   :  { %s5849_s28 = smov 256   ;;  %s5850_s29 = smov 16  }
  0x13   :  { %35 = dma.hbm_to_vmem [thread:$0]  %s5961_s1, 65536, %s30_s19, [#allocation6], %s5849_s28, %s5849_s28, %s5850_s29  }
  0x14   :  { %s5851_s7 = smov [#allocation8]   ;;  %s5730_s11 = scalar_lea.hbm %s5963_s3, 4096 }
  0x15   :  { %s51_s8 = sshll.u32 %s5851_s7, 4  ;;  %p5731_p8 = scmp.ne.s32.totalorder %s5963_s3, %s5730_s11  ;;  %s52_s8 = int_to_ptr.vmem [resolvable:$true] %s51_s8 }
  0x16   :  { %p5734_p9 = scmp.lt.u32.totalorder %s5730_s11, %s5963_s3 }
  0x18   :  { %p5736_p10 = pnand %p5734_p9, %p5731_p8 }
  0x1a   :  { %5739 = shalt.err (!%p5736_p10)
}
  0x1b   :  { %s5740_s16 = scalar_lea.vmem %s52_s8, 4096  ;;  %p5745_p12 = scmp.lt.s32.totalorder %s52_s8, %s52_s8 }
  0x1c   :  { %p5741_p11 = scmp.ne.s32.totalorder %s52_s8, %s5740_s16  ;;  %p5746_p13 = scmp.lt.s32.totalorder %s5740_s16, %s5740_s16 }
  0x1e   :  { %p5747_p0 = por %p5746_p13, %p5745_p12 }
  0x20   :  { %p5748_p1 = pnand %p5747_p0, %p5741_p11 }
  0x22   :  { %5751 = shalt.err (!%p5748_p1)
}
  0x23   :  { %s5852_s1 = smov 64   ;;  %s5853_s17 = smov 4  }
  0x24   :  { %57 = dma.hbm_to_vmem [thread:$0]  %s5963_s3, 4096, %s52_s8, [#allocation9], %s5852_s1, %s5852_s1, %s5853_s17  }
  0x25   :  { %s5854_s20 = smov [#allocation2]   ;;  %s5855_s22 = smov [#allocation7]  }
  0x26   :  { %s20_s21 = sshll.u32 %s5854_s20, 4  ;;  %s42_s23 = sshll.u32 %s5855_s22, 4  ;;  %s21_s21 = int_to_ptr.vmem [resolvable:$true] %s20_s21  ;;  %s43_s23 = int_to_ptr.vmem [resolvable:$true] %s42_s23 }
  0x27   :  { %s5752_s26 = scalar_lea.hbm %s5960_s0, 2048 }
  0x28   :  { %p5753_p2 = scmp.ne.s32.totalorder %s5960_s0, %s5752_s26  ;;  %p5756_p3 = scmp.lt.u32.totalorder %s5752_s26, %s5960_s0 }
  0x2a   :  { %p5758_p4 = pnand %p5756_p3, %p5753_p2 }
  0x2c   :  { %5761 = shalt.err (!%p5758_p4)
}
  0x2d   :  { %s5762_s3 = scalar_lea.vmem %s21_s21, 2048  ;;  %p5767_p6 = scmp.lt.s32.totalorder %s21_s21, %s21_s21 }
  0x2e   :  { %p5763_p5 = scmp.ne.s32.totalorder %s21_s21, %s5762_s3  ;;  %p5768_p7 = scmp.lt.s32.totalorder %s5762_s3, %s5762_s3 }
  0x30   :  { %p5769_p8 = por %p5768_p7, %p5767_p6 }
  0x32   :  { %p5770_p9 = pnand %p5769_p8, %p5763_p5 }
  0x34   :  { %5773 = shalt.err (!%p5770_p9)
}
  0x35   :  { %23 = dma.hbm_to_vmem [thread:$0]  %s5960_s0, 2048, %s21_s21, [#allocation3]  }
  0x36   :  { %s5774_s10 = scalar_lea.hbm %s5962_s2, 64 }
  0x37   :  { %p5775_p10 = scmp.ne.s32.totalorder %s5962_s2, %s5774_s10  ;;  %p5778_p11 = scmp.lt.u32.totalorder %s5774_s10, %s5962_s2 }
  0x39   :  { %p5780_p12 = pnand %p5778_p11, %p5775_p10 }
  0x3b   :  { %5783 = shalt.err (!%p5780_p12)
}
  0x3c   :  { %s5784_s15 = scalar_lea.vmem %s43_s23, 64  ;;  %p5789_p0 = scmp.lt.s32.totalorder %s43_s23, %s43_s23 }
  0x3d   :  { %p5785_p13 = scmp.ne.s32.totalorder %s43_s23, %s5784_s15  ;;  %p5790_p1 = scmp.lt.s32.totalorder %s5784_s15, %s5784_s15 }
  0x3f   :  { %p5791_p2 = por %p5790_p1, %p5789_p0 }
  0x41   :  { %p5792_p3 = pnand %p5791_p2, %p5785_p13 }
  0x43   :  { %5795 = shalt.err (!%p5792_p3)
}
  0x44   :  { %45 = dma.hbm_to_vmem [thread:$0]  %s5962_s2, 64, %s43_s23, [#allocation6]  }
  0x45   :  { %s5856_s1 = smov [#allocation10]   ;;  %s5796_s20 = scalar_lea.hbm %s5964_s4, 16 }
  0x46   :  { %s64_s17 = sshll.u32 %s5856_s1, 4  ;;  %p5797_p4 = scmp.ne.s32.totalorder %s5964_s4, %s5796_s20  ;;  %s65_s17 = int_to_ptr.vmem [resolvable:$true] %s64_s17 }
  0x47   :  { %p5800_p5 = scmp.lt.u32.totalorder %s5796_s20, %s5964_s4 }
  0x49   :  { %p5802_p6 = pnand %p5800_p5, %p5797_p4 }
  0x4b   :  { %5805 = shalt.err (!%p5802_p6)
}
  0x4c   :  { %s5806_s26 = scalar_lea.vmem %s65_s17, 16  ;;  %s5810_s2 = scalar_lea.vmem %s65_s17, 32 }
  0x4d   :  { %p5807_p7 = scmp.ne.s32.totalorder %s65_s17, %s5806_s26  ;;  %p5811_p8 = scmp.lt.s32.totalorder %s65_s17, %s65_s17 }
  0x4e   :  { %p5812_p9 = scmp.lt.s32.totalorder %s5810_s2, %s5806_s26 }
  0x50   :  { %p5813_p10 = por %p5812_p9, %p5811_p8 }
  0x52   :  { %p5814_p11 = pnand %p5813_p10, %p5807_p7 }
  0x54   :  { %5817 = shalt.err (!%p5814_p11)
}
  0x55   :  { %67 = dma.hbm_to_vmem [thread:$0]  %s5964_s4, 16, %s65_s17, [#allocation9]  }
  0x56   :  { %5840 = dma.done.wait [#allocation3], 2048  }
  0x57   :  { %5841 = vsyncadd [#allocation3], 4294965248 }
  0x58   :  { %5842 = dma.done.wait [#allocation6], 65600  }
  0x59   :  { %5843 = vsyncadd [#allocation6], 4294901696 }
  0x5a   :  { %5844 = dma.done.wait [#allocation9], 4112  }
  0x5b   :  { %5845 = vsyncadd [#allocation9], 4294963184  ;;  %v4904_v0 = vld [vmem:[#allocation5 + $0x4] ss:$16 sps:$4 sm:$0xff]   ;;  %v4906_v1 = vld [vmem:[#allocation5 + $0xc] ss:$16 sps:$4 sm:$0xff]  }
  0x5c   :  { %3210 = vmatprep.subr.bf16.mxu0 %v4904_v0  ;;  %v4908_v2 = vld [vmem:[#allocation5] ss:$16 sps:$4 sm:$0xff]   ;;  %v4909_v3 = vld [vmem:[#allocation5 + $0x8] ss:$16 sps:$4 sm:$0xff]   ;;  %3538 = vmatprep.subr.bf16.mxu1 %v4906_v1  ;;  %v4910_v4 = vld [vmem:[#allocation5 + $0x24] ss:$16 sps:$4 sm:$0xff]  }
  0x5d   :  { %3211 = vmatpush1.bf16.msra.mxu0 %v4908_v2  ;;  %3539 = vmatpush1.bf16.msra.mxu1 %v4909_v3  ;;  %v4912_v5 = vld [vmem:[#allocation5 + $0x2c] ss:$16 sps:$4 sm:$0xff]   ;;  %v4914_v6 = vld [vmem:[#allocation5 + $0x20] ss:$16 sps:$4 sm:$0xff]   ;;  %v4915_v7 = vld [vmem:[#allocation5 + $0x28] ss:$16 sps:$4 sm:$0xff]  }
  0x5e   :  { %3212 = vmatprep.subr.bf16.mxu0 %v4910_v4  ;;  %3540 = vmatprep.subr.bf16.mxu1 %v4912_v5  ;;  %v4916_v8 = vld [vmem:[#allocation5 + $0x44] ss:$16 sps:$4 sm:$0xff]   ;;  %v4918_v9 = vld [vmem:[#allocation5 + $0x4c] ss:$16 sps:$4 sm:$0xff]   ;;  %v4920_v10 = vld [vmem:[#allocation5 + $0x40] ss:$16 sps:$4 sm:$0xff]  }
  0x5f   :  { %v4921_v11 = vld [vmem:[#allocation5 + $0x48] ss:$16 sps:$4 sm:$0xff]   ;;  %v4922_v12 = vld [vmem:[#allocation5 + $0x64] ss:$16 sps:$4 sm:$0xff]   ;;  %v4924_v13 = vld [vmem:[#allocation5 + $0x6c] ss:$16 sps:$4 sm:$0xff]  }
  0x60   :  { %v4926_v14 = vld [vmem:[#allocation5 + $0x60] ss:$16 sps:$4 sm:$0xff]   ;;  %v4927_v15 = vld [vmem:[#allocation5 + $0x68] ss:$16 sps:$4 sm:$0xff]   ;;  %v4928_v16 = vld [vmem:[#allocation5 + $0x84] ss:$16 sps:$4 sm:$0xff]  }
  0x61   :  { %3213 = vmatpush1.bf16.msra.mxu0 %v4914_v6  ;;  %3541 = vmatpush1.bf16.msra.mxu1 %v4915_v7  ;;  %v4930_v17 = vld [vmem:[#allocation5 + $0x8c] ss:$16 sps:$4 sm:$0xff]   ;;  %v4932_v18 = vld [vmem:[#allocation5 + $0x80] ss:$16 sps:$4 sm:$0xff]   ;;  %v4933_v19 = vld [vmem:[#allocation5 + $0x88] ss:$16 sps:$4 sm:$0xff]  }
  0x62   :  { %3214 = vmatprep.subr.bf16.mxu0 %v4916_v8  ;;  %3542 = vmatprep.subr.bf16.mxu1 %v4918_v9  ;;  %v4934_v20 = vld [vmem:[#allocation5 + $0xa4] ss:$16 sps:$4 sm:$0xff]   ;;  %v4936_v21 = vld [vmem:[#allocation5 + $0xac] ss:$16 sps:$4 sm:$0xff]   ;;  %v4938_v22 = vld [vmem:[#allocation5 + $0xa0] ss:$16 sps:$4 sm:$0xff]  }
  0x63   :  { %v4939_v23 = vld [vmem:[#allocation5 + $0xa8] ss:$16 sps:$4 sm:$0xff]   ;;  %v4940_v24 = vld [vmem:[#allocation5 + $0xc4] ss:$16 sps:$4 sm:$0xff]   ;;  %v4942_v25 = vld [vmem:[#allocation5 + $0xcc] ss:$16 sps:$4 sm:$0xff]  }
  0x64   :  { %v4944_v26 = vld [vmem:[#allocation5 + $0xc0] ss:$16 sps:$4 sm:$0xff]   ;;  %v4945_v27 = vld [vmem:[#allocation5 + $0xc8] ss:$16 sps:$4 sm:$0xff]   ;;  %v4946_v28 = vld [vmem:[#allocation5 + $0xe4] ss:$16 sps:$4 sm:$0xff]  }
  0x65   :  { %3215 = vmatpush1.bf16.msra.mxu0 %v4920_v10  ;;  %3543 = vmatpush1.bf16.msra.mxu1 %v4921_v11  ;;  %v4948_v29 = vld [vmem:[#allocation5 + $0xec] ss:$16 sps:$4 sm:$0xff]   ;;  %v4950_v30 = vld [vmem:[#allocation5 + $0xe0] ss:$16 sps:$4 sm:$0xff]   ;;  %v4951_v31 = vld [vmem:[#allocation5 + $0xe8] ss:$16 sps:$4 sm:$0xff]  }
  0x66   :  { %3216 = vmatprep.subr.bf16.mxu0 %v4922_v12  ;;  %3544 = vmatprep.subr.bf16.mxu1 %v4924_v13  ;;  %v4952_v32 = vld [vmem:[#allocation5 + $0x104] ss:$16 sps:$4 sm:$0xff]   ;;  %v4954_v33 = vld [vmem:[#allocation5 + $0x10c] ss:$16 sps:$4 sm:$0xff]   ;;  %v4956_v34 = vld [vmem:[#allocation5 + $0x100] ss:$16 sps:$4 sm:$0xff]  }
  0x67   :  { %v4957_v35 = vld [vmem:[#allocation5 + $0x108] ss:$16 sps:$4 sm:$0xff]   ;;  %v4958_v36 = vld [vmem:[#allocation5 + $0x124] ss:$16 sps:$4 sm:$0xff]   ;;  %v4960_v37 = vld [vmem:[#allocation5 + $0x12c] ss:$16 sps:$4 sm:$0xff]  }
  0x68   :  { %v4962_v38 = vld [vmem:[#allocation5 + $0x120] ss:$16 sps:$4 sm:$0xff]   ;;  %v4963_v39 = vld [vmem:[#allocation5 + $0x128] ss:$16 sps:$4 sm:$0xff]   ;;  %v4964_v40 = vld [vmem:[#allocation5 + $0x144] ss:$16 sps:$4 sm:$0xff]  }
  0x69   :  { %3217 = vmatpush1.bf16.msra.mxu0 %v4926_v14  ;;  %3545 = vmatpush1.bf16.msra.mxu1 %v4927_v15  ;;  %v4966_v41 = vld [vmem:[#allocation5 + $0x14c] ss:$16 sps:$4 sm:$0xff]   ;;  %v4968_v42 = vld [vmem:[#allocation5 + $0x140] ss:$16 sps:$4 sm:$0xff]   ;;  %v4969_v43 = vld [vmem:[#allocation5 + $0x148] ss:$16 sps:$4 sm:$0xff]  }
  0x6a   :  { %3218 = vmatprep.subr.bf16.mxu0 %v4928_v16  ;;  %3546 = vmatprep.subr.bf16.mxu1 %v4930_v17  ;;  %v4970_v44 = vld [vmem:[#allocation5 + $0x164] ss:$16 sps:$4 sm:$0xff]   ;;  %v4972_v45 = vld [vmem:[#allocation5 + $0x16c] ss:$16 sps:$4 sm:$0xff]   ;;  %v4974_v47 = vld [vmem:[#allocation5 + $0x160] ss:$16 sps:$4 sm:$0xff]  }
  0x6b   :  { %v85_v46 = vld [vmem:[#allocation2 + $0x8] sm:$0xff]  ;;  %v4976_v50 = vld [vmem:[#allocation5 + $0x184] ss:$16 sps:$4 sm:$0xff]   ;;  %v4980_v52 = vld [vmem:[#allocation5 + $0x180] ss:$16 sps:$4 sm:$0xff]   ;;  %s5857_s4 = smov [#allocation11]  }
  0x6c   :  { %v101_v48 = vpack.c.bf16 %v85_v46, %v85_v46  ;;  %v4975_v49 = vld [vmem:[#allocation5 + $0x168] ss:$16 sps:$4 sm:$0xff]   ;;  %v4978_v51 = vld [vmem:[#allocation5 + $0x18c] ss:$16 sps:$4 sm:$0xff]   ;;  %v4982_v54 = vld [vmem:[#allocation5 + $0x1a4] ss:$16 sps:$4 sm:$0xff]  }
  0x6d   :  { %3219 = vmatpush1.bf16.msra.mxu0 %v4932_v18  ;;  %3547 = vmatpush1.bf16.msra.mxu1 %v4933_v19  ;;  %v4981_v53 = vld [vmem:[#allocation5 + $0x188] ss:$16 sps:$4 sm:$0xff]   ;;  %v4984_v55 = vld [vmem:[#allocation5 + $0x1ac] ss:$16 sps:$4 sm:$0xff]   ;;  %v4986_v56 = vld [vmem:[#allocation5 + $0x1a0] ss:$16 sps:$4 sm:$0xff]  }
  0x6e   :  { %3220 = vmatprep.subr.bf16.mxu0 %v4934_v20  ;;  %3548 = vmatprep.subr.bf16.mxu1 %v4936_v21  ;;  %v4987_v57 = vld [vmem:[#allocation5 + $0x1a8] ss:$16 sps:$4 sm:$0xff]   ;;  %v4988_v58 = vld [vmem:[#allocation5 + $0x1c4] ss:$16 sps:$4 sm:$0xff]   ;;  %v4990_v59 = vld [vmem:[#allocation5 + $0x1cc] ss:$16 sps:$4 sm:$0xff]  }
  0x6f   :  { %3242 = vmatprep.mubr.bf16.mxu0 %v101_v48  ;;  %3570 = vmatprep.mubr.bf16.mxu1 %v101_v48  ;;  %v4992_v60 = vld [vmem:[#allocation5 + $0x1c0] ss:$16 sps:$4 sm:$0xff]   ;;  %v4993_v61 = vld [vmem:[#allocation5 + $0x1c8] ss:$16 sps:$4 sm:$0xff]   ;;  %v4994_v62 = vld [vmem:[#allocation5 + $0x1e4] ss:$16 sps:$4 sm:$0xff]  }
  0x70   :  { %v4996_v63 = vld [vmem:[#allocation5 + $0x1ec] ss:$16 sps:$4 sm:$0xff]   ;;  %v4998_v0 = vld [vmem:[#allocation5 + $0x1e0] ss:$16 sps:$4 sm:$0xff]   ;;  %v4999_v1 = vld [vmem:[#allocation5 + $0x1e8] ss:$16 sps:$4 sm:$0xff]  }
  0x71   :  { %3221 = vmatpush1.bf16.msra.mxu0 %v4938_v22  ;;  %3549 = vmatpush1.bf16.msra.mxu1 %v4939_v23  ;;  %v84_v2 = vld [vmem:[#allocation2] sm:$0xff]  ;;  %v5005_v4 = vld [vmem:[#allocation5 + $0x20c] ss:$16 sps:$4 sm:$0xff]   ;;  %v5003_v7 = vld [vmem:[#allocation5 + $0x208] ss:$16 sps:$4 sm:$0xff]   ;;  %s4234_s28 = sshll.u32 %s5857_s4, 4  ;;  %s4235_s28 = int_to_ptr.vmem [resolvable:$true] %s4234_s28 }
  0x72   :  { %3222 = vmatprep.subr.bf16.mxu0 %v4940_v24  ;;  %3550 = vmatprep.subr.bf16.mxu1 %v4942_v25  ;;  %v5002_v3 = vld [vmem:[#allocation5 + $0x204] ss:$16 sps:$4 sm:$0xff]   ;;  %v100_v5 = vpack.c.bf16 %v84_v2, %v84_v2  ;;  %v5000_v6 = vld [vmem:[#allocation5 + $0x200] ss:$16 sps:$4 sm:$0xff]   ;;  %v5011_v9 = vld [vmem:[#allocation5 + $0x22c] ss:$16 sps:$4 sm:$0xff]   ;;  %p5823_p13 = scmp.lt.s32.totalorder %s4235_s28, %s4235_s28 }
  0x73   :  { %v5008_v8 = vld [vmem:[#allocation5 + $0x224] ss:$16 sps:$4 sm:$0xff]   ;;  %v5006_v10 = vld [vmem:[#allocation5 + $0x220] ss:$16 sps:$4 sm:$0xff]   ;;  %v5009_v11 = vld [vmem:[#allocation5 + $0x228] ss:$16 sps:$4 sm:$0xff]  }
  0x74   :  { %v5014_v12 = vld [vmem:[#allocation5 + $0x244] ss:$16 sps:$4 sm:$0xff]   ;;  %v5017_v13 = vld [vmem:[#allocation5 + $0x24c] ss:$16 sps:$4 sm:$0xff]   ;;  %v5012_v14 = vld [vmem:[#allocation5 + $0x240] ss:$16 sps:$4 sm:$0xff]  }
  0x75   :  { %3223 = vmatpush1.bf16.msra.mxu0 %v4944_v26  ;;  %3551 = vmatpush1.bf16.msra.mxu1 %v4945_v27  ;;  %v5015_v15 = vld [vmem:[#allocation5 + $0x248] ss:$16 sps:$4 sm:$0xff]   ;;  %v5020_v16 = vld [vmem:[#allocation5 + $0x264] ss:$16 sps:$4 sm:$0xff]   ;;  %v5023_v17 = vld [vmem:[#allocation5 + $0x26c] ss:$16 sps:$4 sm:$0xff]  }
  0x76   :  { %3224 = vmatprep.subr.bf16.mxu0 %v4946_v28  ;;  %3552 = vmatprep.subr.bf16.mxu1 %v4948_v29  ;;  %v5018_v18 = vld [vmem:[#allocation5 + $0x260] ss:$16 sps:$4 sm:$0xff]   ;;  %v5021_v19 = vld [vmem:[#allocation5 + $0x268] ss:$16 sps:$4 sm:$0xff]   ;;  %v5026_v20 = vld [vmem:[#allocation5 + $0x284] ss:$16 sps:$4 sm:$0xff]  }
  0x77   :  { %v5029_v21 = vld [vmem:[#allocation5 + $0x28c] ss:$16 sps:$4 sm:$0xff]   ;;  %v5024_v22 = vld [vmem:[#allocation5 + $0x280] ss:$16 sps:$4 sm:$0xff]   ;;  %v5027_v23 = vld [vmem:[#allocation5 + $0x288] ss:$16 sps:$4 sm:$0xff]  }
  0x78   :  { %v5032_v24 = vld [vmem:[#allocation5 + $0x2a4] ss:$16 sps:$4 sm:$0xff]   ;;  %v5035_v25 = vld [vmem:[#allocation5 + $0x2ac] ss:$16 sps:$4 sm:$0xff]   ;;  %v5030_v26 = vld [vmem:[#allocation5 + $0x2a0] ss:$16 sps:$4 sm:$0xff]  }
  0x79   :  { %3225 = vmatpush1.bf16.msra.mxu0 %v4950_v30  ;;  %3553 = vmatpush1.bf16.msra.mxu1 %v4951_v31  ;;  %v5033_v27 = vld [vmem:[#allocation5 + $0x2a8] ss:$16 sps:$4 sm:$0xff]   ;;  %v5038_v28 = vld [vmem:[#allocation5 + $0x2c4] ss:$16 sps:$4 sm:$0xff]   ;;  %v5041_v29 = vld [vmem:[#allocation5 + $0x2cc] ss:$16 sps:$4 sm:$0xff]  }
  0x7a   :  { %3226 = vmatprep.subr.bf16.mxu0 %v4952_v32  ;;  %3554 = vmatprep.subr.bf16.mxu1 %v4954_v33  ;;  %v87_v30 = vld [vmem:[#allocation2 + $0x18] sm:$0xff]  ;;  %v5036_v31 = vld [vmem:[#allocation5 + $0x2c0] ss:$16 sps:$4 sm:$0xff]   ;;  %v5062_v46 = vld [vmem:[#allocation5 + $0x344] ss:$16 sps:$4 sm:$0xff]   ;;  %s5818_s29 = scalar_lea.vmem %s4235_s28, 128 }
  0x7b   :  { %v103_v32 = vpack.c.bf16 %v87_v30, %v87_v30  ;;  %v5039_v33 = vld [vmem:[#allocation5 + $0x2c8] ss:$16 sps:$4 sm:$0xff]   ;;  %v5060_v48 = vld [vmem:[#allocation5 + $0x340] ss:$16 sps:$4 sm:$0xff]   ;;  %v5092_v2 = vld [vmem:[#allocation5 + $0x3e4] ss:$16 sps:$4 sm:$0xff]   ;;  %p5819_p12 = scmp.ne.s32.totalorder %s4235_s28, %s5818_s29  ;;  %p5824_p0 = scmp.lt.s32.totalorder %s5818_s29, %s5818_s29 }
  0x7c   :  { %v5128_v30 = vld [vmem:[#allocation5 + $0x4a4] ss:$16 sps:$4 sm:$0xff]  }
  0x7d   :  { %3227 = vmatpush1.bf16.msra.mxu0 %v4956_v34  ;;  %3555 = vmatpush1.bf16.msra.mxu1 %v4957_v35  ;;  %v5044_v34 = vld [vmem:[#allocation5 + $0x2e4] ss:$16 sps:$4 sm:$0xff]   ;;  %v5047_v35 = vld [vmem:[#allocation5 + $0x2ec] ss:$16 sps:$4 sm:$0xff]   ;;  %p5825_p1 = por %p5824_p0, %p5823_p13 }
  0x7e   :  { %3228 = vmatprep.subr.bf16.mxu0 %v4958_v36  ;;  %3556 = vmatprep.subr.bf16.mxu1 %v4960_v37  ;;  %v5042_v36 = vld [vmem:[#allocation5 + $0x2e0] ss:$16 sps:$4 sm:$0xff]   ;;  %v5045_v37 = vld [vmem:[#allocation5 + $0x2e8] ss:$16 sps:$4 sm:$0xff]  }
  0x7f   :  { %p5826_p2 = pnand %p5825_p1, %p5819_p12 }
  0x81   :  { %3229 = vmatpush1.bf16.msra.mxu0 %v4962_v38  ;;  %3557 = vmatpush1.bf16.msra.mxu1 %v4963_v39  ;;  %v5050_v38 = vld [vmem:[#allocation5 + $0x304] ss:$16 sps:$4 sm:$0xff]   ;;  %v5053_v39 = vld [vmem:[#allocation5 + $0x30c] ss:$16 sps:$4 sm:$0xff]  }
  0x82   :  { %3230 = vmatprep.subr.bf16.mxu0 %v4964_v40  ;;  %3558 = vmatprep.subr.bf16.mxu1 %v4966_v41  ;;  %v5048_v40 = vld [vmem:[#allocation5 + $0x300] ss:$16 sps:$4 sm:$0xff]   ;;  %v5051_v41 = vld [vmem:[#allocation5 + $0x308] ss:$16 sps:$4 sm:$0xff]  }
  0x85   :  { %3231 = vmatpush1.bf16.msra.mxu0 %v4968_v42  ;;  %3559 = vmatpush1.bf16.msra.mxu1 %v4969_v43  ;;  %v5056_v42 = vld [vmem:[#allocation5 + $0x324] ss:$16 sps:$4 sm:$0xff]   ;;  %v5059_v43 = vld [vmem:[#allocation5 + $0x32c] ss:$16 sps:$4 sm:$0xff]  }
  0x86   :  { %3232 = vmatprep.subr.bf16.mxu0 %v4970_v44  ;;  %3560 = vmatprep.subr.bf16.mxu1 %v4972_v45  ;;  %v5054_v44 = vld [vmem:[#allocation5 + $0x320] ss:$16 sps:$4 sm:$0xff]   ;;  %v5057_v45 = vld [vmem:[#allocation5 + $0x328] ss:$16 sps:$4 sm:$0xff]  }
  0x89   :  { %3233 = vmatpush1.bf16.msra.mxu0 %v4974_v47  ;;  %3561 = vmatpush1.bf16.msra.mxu1 %v4975_v49  ;;  %v5065_v47 = vld [vmem:[#allocation5 + $0x34c] ss:$16 sps:$4 sm:$0xff]   ;;  %v5063_v49 = vld [vmem:[#allocation5 + $0x348] ss:$16 sps:$4 sm:$0xff]  }
  0x8a   :  { %3234 = vmatprep.subr.bf16.mxu0 %v4976_v50  ;;  %3562 = vmatprep.subr.bf16.mxu1 %v4978_v51  ;;  %v5068_v50 = vld [vmem:[#allocation5 + $0x364] ss:$16 sps:$4 sm:$0xff]   ;;  %v5071_v51 = vld [vmem:[#allocation5 + $0x36c] ss:$16 sps:$4 sm:$0xff]  }
  0x8d   :  { %3235 = vmatpush1.bf16.msra.mxu0 %v4980_v52  ;;  %3563 = vmatpush1.bf16.msra.mxu1 %v4981_v53  ;;  %v5066_v52 = vld [vmem:[#allocation5 + $0x360] ss:$16 sps:$4 sm:$0xff]   ;;  %v5069_v53 = vld [vmem:[#allocation5 + $0x368] ss:$16 sps:$4 sm:$0xff]  }
  0x8e   :  { %3236 = vmatprep.subr.bf16.mxu0 %v4982_v54  ;;  %3564 = vmatprep.subr.bf16.mxu1 %v4984_v55  ;;  %v5074_v54 = vld [vmem:[#allocation5 + $0x384] ss:$16 sps:$4 sm:$0xff]   ;;  %v5077_v55 = vld [vmem:[#allocation5 + $0x38c] ss:$16 sps:$4 sm:$0xff]  }
  0x91   :  { %3237 = vmatpush1.bf16.msra.mxu0 %v4986_v56  ;;  %3565 = vmatpush1.bf16.msra.mxu1 %v4987_v57  ;;  %v5072_v56 = vld [vmem:[#allocation5 + $0x380] ss:$16 sps:$4 sm:$0xff]   ;;  %v5075_v57 = vld [vmem:[#allocation5 + $0x388] ss:$16 sps:$4 sm:$0xff]  }
  0x92   :  { %3238 = vmatprep.subr.bf16.mxu0 %v4988_v58  ;;  %3566 = vmatprep.subr.bf16.mxu1 %v4990_v59  ;;  %v5080_v58 = vld [vmem:[#allocation5 + $0x3a4] ss:$16 sps:$4 sm:$0xff]   ;;  %v5083_v59 = vld [vmem:[#allocation5 + $0x3ac] ss:$16 sps:$4 sm:$0xff]  }
  0x95   :  { %3239 = vmatpush1.bf16.msra.mxu0 %v4992_v60  ;;  %3567 = vmatpush1.bf16.msra.mxu1 %v4993_v61  ;;  %v5078_v60 = vld [vmem:[#allocation5 + $0x3a0] ss:$16 sps:$4 sm:$0xff]   ;;  %v5081_v61 = vld [vmem:[#allocation5 + $0x3a8] ss:$16 sps:$4 sm:$0xff]  }
  0x96   :  { %3240 = vmatprep.subr.bf16.mxu0 %v4994_v62  ;;  %3568 = vmatprep.subr.bf16.mxu1 %v4996_v63  ;;  %v5086_v62 = vld [vmem:[#allocation5 + $0x3c4] ss:$16 sps:$4 sm:$0xff]   ;;  %v5089_v63 = vld [vmem:[#allocation5 + $0x3cc] ss:$16 sps:$4 sm:$0xff]  }
  0x99   :  { %3241 = vmatpush1.bf16.msra.mxu0 %v4998_v0  ;;  %3569 = vmatpush1.bf16.msra.mxu1 %v4999_v1  ;;  %v5084_v0 = vld [vmem:[#allocation5 + $0x3c0] ss:$16 sps:$4 sm:$0xff]   ;;  %v5087_v1 = vld [vmem:[#allocation5 + $0x3c8] ss:$16 sps:$4 sm:$0xff]  }
  0x9a   :  { %3251 = vmatprep.subr.bf16.mxu0 %v5002_v3  ;;  %3579 = vmatprep.subr.bf16.mxu1 %v5005_v4  ;;  %v5095_v3 = vld [vmem:[#allocation5 + $0x3ec] ss:$16 sps:$4 sm:$0xff]   ;;  %v5090_v4 = vld [vmem:[#allocation5 + $0x3e0] ss:$16 sps:$4 sm:$0xff]  }
  0x9c   :  { %3243 = vmatmul.mubr.bf16.vlgmr.msra.gmra.mrb[0].mxu0 %v100_v5  ;;  %3571 = vmatmul.mubr.bf16.vlgmr.msra.gmra.mrb[0].mxu1 %v100_v5  ;;  %v5093_v5 = vld [vmem:[#allocation5 + $0x3e8] ss:$16 sps:$4 sm:$0xff]  }
  0x9d   :  { %3252 = vmatpush1.bf16.msra.mxu0 %v5000_v6  ;;  %3580 = vmatpush1.bf16.msra.mxu1 %v5003_v7  ;;  %v5098_v6 = vld [vmem:[#allocation5 + $0x404] ss:$16 sps:$4 sm:$0xff]  }
  0x9e   :  { %3253 = vmatprep.subr.bf16.mxu0 %v5008_v8  ;;  %3581 = vmatprep.subr.bf16.mxu1 %v5011_v9  ;;  %v86_v7 = vld [vmem:[#allocation2 + $0x10] sm:$0xff]  ;;  %v5101_v8 = vld [vmem:[#allocation5 + $0x40c] ss:$16 sps:$4 sm:$0xff]  }
  0x9f   :  { %3283 = vmatprep.mubr.bf16.mxu0 %v103_v32  ;;  %3611 = vmatprep.mubr.bf16.mxu1 %v103_v32  ;;  %v5096_v9 = vld [vmem:[#allocation5 + $0x400] ss:$16 sps:$4 sm:$0xff]  }
  0xa0   :  { %v5126_v32 = vld [vmem:[#allocation5 + $0x4a0] ss:$16 sps:$4 sm:$0xff]  }
  0xa1   :  { %3254 = vmatpush1.bf16.msra.mxu0 %v5006_v10  ;;  %3582 = vmatpush1.bf16.msra.mxu1 %v5009_v11  ;;  %v5099_v10 = vld [vmem:[#allocation5 + $0x408] ss:$16 sps:$4 sm:$0xff]   ;;  %v102_v11 = vpack.c.bf16 %v86_v7, %v86_v7  ;;  %v5191_v7 = vld [vmem:[#allocation5 + $0x5ec] ss:$16 sps:$4 sm:$0xff]  }
  0xa2   :  { %3255 = vmatprep.subr.bf16.mxu0 %v5014_v12  ;;  %3583 = vmatprep.subr.bf16.mxu1 %v5017_v13  ;;  %v5104_v12 = vld [vmem:[#allocation5 + $0x424] ss:$16 sps:$4 sm:$0xff]   ;;  %v5107_v13 = vld [vmem:[#allocation5 + $0x42c] ss:$16 sps:$4 sm:$0xff]  }
  0xa5   :  { %3256 = vmatpush1.bf16.msra.mxu0 %v5012_v14  ;;  %3584 = vmatpush1.bf16.msra.mxu1 %v5015_v15  ;;  %v89_v14 = vld [vmem:[#allocation2 + $0x28] sm:$0xff] }
  0xa6   :  { %3257 = vmatprep.subr.bf16.mxu0 %v5020_v16  ;;  %3585 = vmatprep.subr.bf16.mxu1 %v5023_v17  ;;  %v105_v15 = vpack.c.bf16 %v89_v14, %v89_v14  ;;  %v5102_v16 = vld [vmem:[#allocation5 + $0x420] ss:$16 sps:$4 sm:$0xff]   ;;  %v5105_v17 = vld [vmem:[#allocation5 + $0x428] ss:$16 sps:$4 sm:$0xff]  }
  0xa7   :  { %v5195_v14 = vld [vmem:[#allocation5 + $0x608] ss:$16 sps:$4 sm:$0xff]  }
  0xa9   :  { %3258 = vmatpush1.bf16.msra.mxu0 %v5018_v18  ;;  %3586 = vmatpush1.bf16.msra.mxu1 %v5021_v19  ;;  %v5110_v18 = vld [vmem:[#allocation5 + $0x444] ss:$16 sps:$4 sm:$0xff]   ;;  %v5113_v19 = vld [vmem:[#allocation5 + $0x44c] ss:$16 sps:$4 sm:$0xff]  }
  0xaa   :  { %3259 = vmatprep.subr.bf16.mxu0 %v5026_v20  ;;  %3587 = vmatprep.subr.bf16.mxu1 %v5029_v21  ;;  %v5108_v20 = vld [vmem:[#allocation5 + $0x440] ss:$16 sps:$4 sm:$0xff]   ;;  %v5111_v21 = vld [vmem:[#allocation5 + $0x448] ss:$16 sps:$4 sm:$0xff]  }
  0xad   :  { %3260 = vmatpush1.bf16.msra.mxu0 %v5024_v22  ;;  %3588 = vmatpush1.bf16.msra.mxu1 %v5027_v23  ;;  %v5116_v22 = vld [vmem:[#allocation5 + $0x464] ss:$16 sps:$4 sm:$0xff]   ;;  %v5119_v23 = vld [vmem:[#allocation5 + $0x46c] ss:$16 sps:$4 sm:$0xff]  }
  0xae   :  { %3261 = vmatprep.subr.bf16.mxu0 %v5032_v24  ;;  %3589 = vmatprep.subr.bf16.mxu1 %v5035_v25  ;;  %v5114_v24 = vld [vmem:[#allocation5 + $0x460] ss:$16 sps:$4 sm:$0xff]   ;;  %v5117_v25 = vld [vmem:[#allocation5 + $0x468] ss:$16 sps:$4 sm:$0xff]  }
  0xb1   :  { %3262 = vmatpush1.bf16.msra.mxu0 %v5030_v26  ;;  %3590 = vmatpush1.bf16.msra.mxu1 %v5033_v27  ;;  %v5122_v26 = vld [vmem:[#allocation5 + $0x484] ss:$16 sps:$4 sm:$0xff]   ;;  %v5125_v27 = vld [vmem:[#allocation5 + $0x48c] ss:$16 sps:$4 sm:$0xff]  }
  0xb2   :  { %3263 = vmatprep.subr.bf16.mxu0 %v5038_v28  ;;  %3591 = vmatprep.subr.bf16.mxu1 %v5041_v29  ;;  %v5120_v28 = vld [vmem:[#allocation5 + $0x480] ss:$16 sps:$4 sm:$0xff]   ;;  %v5123_v29 = vld [vmem:[#allocation5 + $0x488] ss:$16 sps:$4 sm:$0xff]  }
  0xb5   :  { %3264 = vmatpush1.bf16.msra.mxu0 %v5036_v31  ;;  %3592 = vmatpush1.bf16.msra.mxu1 %v5039_v33  ;;  %v5131_v31 = vld [vmem:[#allocation5 + $0x4ac] ss:$16 sps:$4 sm:$0xff]   ;;  %v5129_v33 = vld [vmem:[#allocation5 + $0x4a8] ss:$16 sps:$4 sm:$0xff]  }
  0xb6   :  { %3265 = vmatprep.subr.bf16.mxu0 %v5044_v34  ;;  %3593 = vmatprep.subr.bf16.mxu1 %v5047_v35  ;;  %v5134_v34 = vld [vmem:[#allocation5 + $0x4c4] ss:$16 sps:$4 sm:$0xff]   ;;  %v5137_v35 = vld [vmem:[#allocation5 + $0x4cc] ss:$16 sps:$4 sm:$0xff]  }
  0xb9   :  { %3266 = vmatpush1.bf16.msra.mxu0 %v5042_v36  ;;  %3594 = vmatpush1.bf16.msra.mxu1 %v5045_v37  ;;  %v5132_v36 = vld [vmem:[#allocation5 + $0x4c0] ss:$16 sps:$4 sm:$0xff]   ;;  %v5135_v37 = vld [vmem:[#allocation5 + $0x4c8] ss:$16 sps:$4 sm:$0xff]  }
  0xba   :  { %3267 = vmatprep.subr.bf16.mxu0 %v5050_v38  ;;  %3595 = vmatprep.subr.bf16.mxu1 %v5053_v39  ;;  %v5140_v38 = vld [vmem:[#allocation5 + $0x4e4] ss:$16 sps:$4 sm:$0xff]   ;;  %v5143_v39 = vld [vmem:[#allocation5 + $0x4ec] ss:$16 sps:$4 sm:$0xff]  }
  0xbd   :  { %3268 = vmatpush1.bf16.msra.mxu0 %v5048_v40  ;;  %3596 = vmatpush1.bf16.msra.mxu1 %v5051_v41  ;;  %v5138_v40 = vld [vmem:[#allocation5 + $0x4e0] ss:$16 sps:$4 sm:$0xff]   ;;  %v5141_v41 = vld [vmem:[#allocation5 + $0x4e8] ss:$16 sps:$4 sm:$0xff]  }
  0xbe   :  { %3269 = vmatprep.subr.bf16.mxu0 %v5056_v42  ;;  %3597 = vmatprep.subr.bf16.mxu1 %v5059_v43  ;;  %v5146_v42 = vld [vmem:[#allocation5 + $0x504] ss:$16 sps:$4 sm:$0xff]   ;;  %v5149_v43 = vld [vmem:[#allocation5 + $0x50c] ss:$16 sps:$4 sm:$0xff]  }
  0xc1   :  { %3270 = vmatpush1.bf16.msra.mxu0 %v5054_v44  ;;  %3598 = vmatpush1.bf16.msra.mxu1 %v5057_v45  ;;  %v5144_v44 = vld [vmem:[#allocation5 + $0x500] ss:$16 sps:$4 sm:$0xff]   ;;  %v5147_v45 = vld [vmem:[#allocation5 + $0x508] ss:$16 sps:$4 sm:$0xff]  }
  0xc2   :  { %3271 = vmatprep.subr.bf16.mxu0 %v5062_v46  ;;  %3599 = vmatprep.subr.bf16.mxu1 %v5065_v47  ;;  %v5152_v46 = vld [vmem:[#allocation5 + $0x524] ss:$16 sps:$4 sm:$0xff]   ;;  %v5155_v47 = vld [vmem:[#allocation5 + $0x52c] ss:$16 sps:$4 sm:$0xff]  }
  0xc5   :  { %3272 = vmatpush1.bf16.msra.mxu0 %v5060_v48  ;;  %3600 = vmatpush1.bf16.msra.mxu1 %v5063_v49  ;;  %v5150_v48 = vld [vmem:[#allocation5 + $0x520] ss:$16 sps:$4 sm:$0xff]   ;;  %v5153_v49 = vld [vmem:[#allocation5 + $0x528] ss:$16 sps:$4 sm:$0xff]  }
  0xc6   :  { %3273 = vmatprep.subr.bf16.mxu0 %v5068_v50  ;;  %3601 = vmatprep.subr.bf16.mxu1 %v5071_v51  ;;  %v5158_v50 = vld [vmem:[#allocation5 + $0x544] ss:$16 sps:$4 sm:$0xff]   ;;  %v5161_v51 = vld [vmem:[#allocation5 + $0x54c] ss:$16 sps:$4 sm:$0xff]  }
  0xc9   :  { %3274 = vmatpush1.bf16.msra.mxu0 %v5066_v52  ;;  %3602 = vmatpush1.bf16.msra.mxu1 %v5069_v53  ;;  %v5156_v52 = vld [vmem:[#allocation5 + $0x540] ss:$16 sps:$4 sm:$0xff]   ;;  %v5159_v53 = vld [vmem:[#allocation5 + $0x548] ss:$16 sps:$4 sm:$0xff]  }
  0xca   :  { %3275 = vmatprep.subr.bf16.mxu0 %v5074_v54  ;;  %3603 = vmatprep.subr.bf16.mxu1 %v5077_v55  ;;  %v5164_v54 = vld [vmem:[#allocation5 + $0x564] ss:$16 sps:$4 sm:$0xff]   ;;  %v5167_v55 = vld [vmem:[#allocation5 + $0x56c] ss:$16 sps:$4 sm:$0xff]  }
  0xcd   :  { %3276 = vmatpush1.bf16.msra.mxu0 %v5072_v56  ;;  %3604 = vmatpush1.bf16.msra.mxu1 %v5075_v57  ;;  %v5162_v56 = vld [vmem:[#allocation5 + $0x560] ss:$16 sps:$4 sm:$0xff]   ;;  %v5165_v57 = vld [vmem:[#allocation5 + $0x568] ss:$16 sps:$4 sm:$0xff]  }
  0xce   :  { %3277 = vmatprep.subr.bf16.mxu0 %v5080_v58  ;;  %3605 = vmatprep.subr.bf16.mxu1 %v5083_v59  ;;  %v5170_v58 = vld [vmem:[#allocation5 + $0x584] ss:$16 sps:$4 sm:$0xff]   ;;  %v5173_v59 = vld [vmem:[#allocation5 + $0x58c] ss:$16 sps:$4 sm:$0xff]  }
  0xd1   :  { %3278 = vmatpush1.bf16.msra.mxu0 %v5078_v60  ;;  %3606 = vmatpush1.bf16.msra.mxu1 %v5081_v61  ;;  %v5168_v60 = vld [vmem:[#allocation5 + $0x580] ss:$16 sps:$4 sm:$0xff]   ;;  %v5171_v61 = vld [vmem:[#allocation5 + $0x588] ss:$16 sps:$4 sm:$0xff]  }
  0xd2   :  { %3279 = vmatprep.subr.bf16.mxu0 %v5086_v62  ;;  %3607 = vmatprep.subr.bf16.mxu1 %v5089_v63  ;;  %v5176_v62 = vld [vmem:[#allocation5 + $0x5a4] ss:$16 sps:$4 sm:$0xff]   ;;  %v5179_v63 = vld [vmem:[#allocation5 + $0x5ac] ss:$16 sps:$4 sm:$0xff]  }
  0xd5   :  { %3280 = vmatpush1.bf16.msra.mxu0 %v5084_v0  ;;  %3608 = vmatpush1.bf16.msra.mxu1 %v5087_v1  ;;  %v5174_v0 = vld [vmem:[#allocation5 + $0x5a0] ss:$16 sps:$4 sm:$0xff]   ;;  %v5177_v1 = vld [vmem:[#allocation5 + $0x5a8] ss:$16 sps:$4 sm:$0xff]  }
  0xd6   :  { %3281 = vmatprep.subr.bf16.mxu0 %v5092_v2  ;;  %3609 = vmatprep.subr.bf16.mxu1 %v5095_v3  ;;  %v5182_v2 = vld [vmem:[#allocation5 + $0x5c4] ss:$16 sps:$4 sm:$0xff]   ;;  %v5185_v3 = vld [vmem:[#allocation5 + $0x5cc] ss:$16 sps:$4 sm:$0xff]  }
  0xd9   :  { %3282 = vmatpush1.bf16.msra.mxu0 %v5090_v4  ;;  %3610 = vmatpush1.bf16.msra.mxu1 %v5093_v5  ;;  %v5180_v4 = vld [vmem:[#allocation5 + $0x5c0] ss:$16 sps:$4 sm:$0xff]   ;;  %v5183_v5 = vld [vmem:[#allocation5 + $0x5c8] ss:$16 sps:$4 sm:$0xff]  }
  0xda   :  { %3292 = vmatprep.subr.bf16.mxu0 %v5098_v6  ;;  %3620 = vmatprep.subr.bf16.mxu1 %v5101_v8  ;;  %v5188_v6 = vld [vmem:[#allocation5 + $0x5e4] ss:$16 sps:$4 sm:$0xff]   ;;  %v5186_v8 = vld [vmem:[#allocation5 + $0x5e0] ss:$16 sps:$4 sm:$0xff]  }
  0xdc   :  { %3284 = vmatmul.mubr.bf16.vlgmr.msra.gmra.mrb[0].mxu0 %v102_v11  ;;  %3612 = vmatmul.mubr.bf16.vlgmr.msra.gmra.mrb[0].mxu1 %v102_v11  ;;  %v88_v11 = vld [vmem:[#allocation2 + $0x20] sm:$0xff] }
  0xdd   :  { %3293 = vmatpush1.bf16.msra.mxu0 %v5096_v9  ;;  %3621 = vmatpush1.bf16.msra.mxu1 %v5099_v10  ;;  %v5189_v9 = vld [vmem:[#allocation5 + $0x5e8] ss:$16 sps:$4 sm:$0xff]   ;;  %v5194_v10 = vld [vmem:[#allocation5 + $0x604] ss:$16 sps:$4 sm:$0xff]  }
  0xde   :  { %3294 = vmatprep.subr.bf16.mxu0 %v5104_v12  ;;  %3622 = vmatprep.subr.bf16.mxu1 %v5107_v13  ;;  %v5197_v12 = vld [vmem:[#allocation5 + $0x60c] ss:$16 sps:$4 sm:$0xff]   ;;  %v5192_v13 = vld [vmem:[#allocation5 + $0x600] ss:$16 sps:$4 sm:$0xff]  }
  0xdf   :  { %3324 = vmatprep.mubr.bf16.mxu0 %v105_v15  ;;  %3652 = vmatprep.mubr.bf16.mxu1 %v105_v15  ;;  %v104_v15 = vpack.c.bf16 %v88_v11, %v88_v11  ;;  %v5287_v11 = vld [vmem:[#allocation5 + $0x7ec] ss:$16 sps:$4 sm:$0xff]  }
  0xe1   :  { %3295 = vmatpush1.bf16.msra.mxu0 %v5102_v16  ;;  %3623 = vmatpush1.bf16.msra.mxu1 %v5105_v17  ;;  %v91_v16 = vld [vmem:[#allocation2 + $0x38] sm:$0xff]  ;;  %v5200_v17 = vld [vmem:[#allocation5 + $0x624] ss:$16 sps:$4 sm:$0xff]  }
  0xe2   :  { %3296 = vmatprep.subr.bf16.mxu0 %v5110_v18  ;;  %3624 = vmatprep.subr.bf16.mxu1 %v5113_v19  ;;  %v5203_v18 = vld [vmem:[#allocation5 + $0x62c] ss:$16 sps:$4 sm:$0xff]   ;;  %v107_v19 = vpack.c.bf16 %v91_v16, %v91_v16 }
  0xe3   :  { %v5293_v16 = vld [vmem:[#allocation5 + $0x80c] ss:$16 sps:$4 sm:$0xff]  }
  0xe5   :  { %3297 = vmatpush1.bf16.msra.mxu0 %v5108_v20  ;;  %3625 = vmatpush1.bf16.msra.mxu1 %v5111_v21  ;;  %v5198_v20 = vld [vmem:[#allocation5 + $0x620] ss:$16 sps:$4 sm:$0xff]   ;;  %v5201_v21 = vld [vmem:[#allocation5 + $0x628] ss:$16 sps:$4 sm:$0xff]  }
  0xe6   :  { %3298 = vmatprep.subr.bf16.mxu0 %v5116_v22  ;;  %3626 = vmatprep.subr.bf16.mxu1 %v5119_v23  ;;  %v5206_v22 = vld [vmem:[#allocation5 + $0x644] ss:$16 sps:$4 sm:$0xff]   ;;  %v5209_v23 = vld [vmem:[#allocation5 + $0x64c] ss:$16 sps:$4 sm:$0xff]  }
  0xe9   :  { %3299 = vmatpush1.bf16.msra.mxu0 %v5114_v24  ;;  %3627 = vmatpush1.bf16.msra.mxu1 %v5117_v25  ;;  %v5204_v24 = vld [vmem:[#allocation5 + $0x640] ss:$16 sps:$4 sm:$0xff]   ;;  %v5207_v25 = vld [vmem:[#allocation5 + $0x648] ss:$16 sps:$4 sm:$0xff]  }
  0xea   :  { %3300 = vmatprep.subr.bf16.mxu0 %v5122_v26  ;;  %3628 = vmatprep.subr.bf16.mxu1 %v5125_v27  ;;  %v5212_v26 = vld [vmem:[#allocation5 + $0x664] ss:$16 sps:$4 sm:$0xff]   ;;  %v5215_v27 = vld [vmem:[#allocation5 + $0x66c] ss:$16 sps:$4 sm:$0xff]  }
  0xed   :  { %3301 = vmatpush1.bf16.msra.mxu0 %v5120_v28  ;;  %3629 = vmatpush1.bf16.msra.mxu1 %v5123_v29  ;;  %v5210_v28 = vld [vmem:[#allocation5 + $0x660] ss:$16 sps:$4 sm:$0xff]   ;;  %v5213_v29 = vld [vmem:[#allocation5 + $0x668] ss:$16 sps:$4 sm:$0xff]  }
  0xee   :  { %3302 = vmatprep.subr.bf16.mxu0 %v5128_v30  ;;  %3630 = vmatprep.subr.bf16.mxu1 %v5131_v31  ;;  %v5218_v30 = vld [vmem:[#allocation5 + $0x684] ss:$16 sps:$4 sm:$0xff]   ;;  %v5221_v31 = vld [vmem:[#allocation5 + $0x68c] ss:$16 sps:$4 sm:$0xff]  }
  0xf1   :  { %3303 = vmatpush1.bf16.msra.mxu0 %v5126_v32  ;;  %3631 = vmatpush1.bf16.msra.mxu1 %v5129_v33  ;;  %v5216_v32 = vld [vmem:[#allocation5 + $0x680] ss:$16 sps:$4 sm:$0xff]   ;;  %v5219_v33 = vld [vmem:[#allocation5 + $0x688] ss:$16 sps:$4 sm:$0xff]  }
  0xf2   :  { %3304 = vmatprep.subr.bf16.mxu0 %v5134_v34  ;;  %3632 = vmatprep.subr.bf16.mxu1 %v5137_v35  ;;  %v5224_v34 = vld [vmem:[#allocation5 + $0x6a4] ss:$16 sps:$4 sm:$0xff]   ;;  %v5227_v35 = vld [vmem:[#allocation5 + $0x6ac] ss:$16 sps:$4 sm:$0xff]  }
  0xf5   :  { %3305 = vmatpush1.bf16.msra.mxu0 %v5132_v36  ;;  %3633 = vmatpush1.bf16.msra.mxu1 %v5135_v37  ;;  %v5222_v36 = vld [vmem:[#allocation5 + $0x6a0] ss:$16 sps:$4 sm:$0xff]   ;;  %v5225_v37 = vld [vmem:[#allocation5 + $0x6a8] ss:$16 sps:$4 sm:$0xff]  }
  0xf6   :  { %3306 = vmatprep.subr.bf16.mxu0 %v5140_v38  ;;  %3634 = vmatprep.subr.bf16.mxu1 %v5143_v39  ;;  %v5230_v38 = vld [vmem:[#allocation5 + $0x6c4] ss:$16 sps:$4 sm:$0xff]   ;;  %v5233_v39 = vld [vmem:[#allocation5 + $0x6cc] ss:$16 sps:$4 sm:$0xff]  }
  0xf9   :  { %3307 = vmatpush1.bf16.msra.mxu0 %v5138_v40  ;;  %3635 = vmatpush1.bf16.msra.mxu1 %v5141_v41  ;;  %v5228_v40 = vld [vmem:[#allocation5 + $0x6c0] ss:$16 sps:$4 sm:$0xff]   ;;  %v5231_v41 = vld [vmem:[#allocation5 + $0x6c8] ss:$16 sps:$4 sm:$0xff]  }
  0xfa   :  { %3308 = vmatprep.subr.bf16.mxu0 %v5146_v42  ;;  %3636 = vmatprep.subr.bf16.mxu1 %v5149_v43  ;;  %v5236_v42 = vld [vmem:[#allocation5 + $0x6e4] ss:$16 sps:$4 sm:$0xff]   ;;  %v5239_v43 = vld [vmem:[#allocation5 + $0x6ec] ss:$16 sps:$4 sm:$0xff]  }
  0xfd   :  { %3309 = vmatpush1.bf16.msra.mxu0 %v5144_v44  ;;  %3637 = vmatpush1.bf16.msra.mxu1 %v5147_v45  ;;  %v5234_v44 = vld [vmem:[#allocation5 + $0x6e0] ss:$16 sps:$4 sm:$0xff]   ;;  %v5237_v45 = vld [vmem:[#allocation5 + $0x6e8] ss:$16 sps:$4 sm:$0xff]  }
  0xfe   :  { %3310 = vmatprep.subr.bf16.mxu0 %v5152_v46  ;;  %3638 = vmatprep.subr.bf16.mxu1 %v5155_v47  ;;  %v5242_v46 = vld [vmem:[#allocation5 + $0x704] ss:$16 sps:$4 sm:$0xff]   ;;  %v5245_v47 = vld [vmem:[#allocation5 + $0x70c] ss:$16 sps:$4 sm:$0xff]  }
 0x101   :  { %3311 = vmatpush1.bf16.msra.mxu0 %v5150_v48  ;;  %3639 = vmatpush1.bf16.msra.mxu1 %v5153_v49  ;;  %v5240_v48 = vld [vmem:[#allocation5 + $0x700] ss:$16 sps:$4 sm:$0xff]   ;;  %v5243_v49 = vld [vmem:[#allocation5 + $0x708] ss:$16 sps:$4 sm:$0xff]  }
 0x102   :  { %3312 = vmatprep.subr.bf16.mxu0 %v5158_v50  ;;  %3640 = vmatprep.subr.bf16.mxu1 %v5161_v51  ;;  %v5248_v50 = vld [vmem:[#allocation5 + $0x724] ss:$16 sps:$4 sm:$0xff]   ;;  %v5251_v51 = vld [vmem:[#allocation5 + $0x72c] ss:$16 sps:$4 sm:$0xff]  }
 0x105   :  { %3313 = vmatpush1.bf16.msra.mxu0 %v5156_v52  ;;  %3641 = vmatpush1.bf16.msra.mxu1 %v5159_v53  ;;  %v5246_v52 = vld [vmem:[#allocation5 + $0x720] ss:$16 sps:$4 sm:$0xff]   ;;  %v5249_v53 = vld [vmem:[#allocation5 + $0x728] ss:$16 sps:$4 sm:$0xff]  }
 0x106   :  { %3314 = vmatprep.subr.bf16.mxu0 %v5164_v54  ;;  %3642 = vmatprep.subr.bf16.mxu1 %v5167_v55  ;;  %v5254_v54 = vld [vmem:[#allocation5 + $0x744] ss:$16 sps:$4 sm:$0xff]   ;;  %v5257_v55 = vld [vmem:[#allocation5 + $0x74c] ss:$16 sps:$4 sm:$0xff]  }
 0x109   :  { %3315 = vmatpush1.bf16.msra.mxu0 %v5162_v56  ;;  %3643 = vmatpush1.bf16.msra.mxu1 %v5165_v57  ;;  %v5252_v56 = vld [vmem:[#allocation5 + $0x740] ss:$16 sps:$4 sm:$0xff]   ;;  %v5255_v57 = vld [vmem:[#allocation5 + $0x748] ss:$16 sps:$4 sm:$0xff]  }
 0x10a   :  { %3316 = vmatprep.subr.bf16.mxu0 %v5170_v58  ;;  %3644 = vmatprep.subr.bf16.mxu1 %v5173_v59  ;;  %v5260_v58 = vld [vmem:[#allocation5 + $0x764] ss:$16 sps:$4 sm:$0xff]   ;;  %v5263_v59 = vld [vmem:[#allocation5 + $0x76c] ss:$16 sps:$4 sm:$0xff]  }
 0x10d   :  { %3317 = vmatpush1.bf16.msra.mxu0 %v5168_v60  ;;  %3645 = vmatpush1.bf16.msra.mxu1 %v5171_v61  ;;  %v5258_v60 = vld [vmem:[#allocation5 + $0x760] ss:$16 sps:$4 sm:$0xff]   ;;  %v5261_v61 = vld [vmem:[#allocation5 + $0x768] ss:$16 sps:$4 sm:$0xff]  }
 0x10e   :  { %3318 = vmatprep.subr.bf16.mxu0 %v5176_v62  ;;  %3646 = vmatprep.subr.bf16.mxu1 %v5179_v63  ;;  %v5266_v62 = vld [vmem:[#allocation5 + $0x784] ss:$16 sps:$4 sm:$0xff]   ;;  %v5269_v63 = vld [vmem:[#allocation5 + $0x78c] ss:$16 sps:$4 sm:$0xff]  }
 0x111   :  { %3319 = vmatpush1.bf16.msra.mxu0 %v5174_v0  ;;  %3647 = vmatpush1.bf16.msra.mxu1 %v5177_v1  ;;  %v5264_v0 = vld [vmem:[#allocation5 + $0x780] ss:$16 sps:$4 sm:$0xff]   ;;  %v5267_v1 = vld [vmem:[#allocation5 + $0x788] ss:$16 sps:$4 sm:$0xff]  }
 0x112   :  { %3320 = vmatprep.subr.bf16.mxu0 %v5182_v2  ;;  %3648 = vmatprep.subr.bf16.mxu1 %v5185_v3  ;;  %v5272_v2 = vld [vmem:[#allocation5 + $0x7a4] ss:$16 sps:$4 sm:$0xff]   ;;  %v5275_v3 = vld [vmem:[#allocation5 + $0x7ac] ss:$16 sps:$4 sm:$0xff]  }
 0x115   :  { %3321 = vmatpush1.bf16.msra.mxu0 %v5180_v4  ;;  %3649 = vmatpush1.bf16.msra.mxu1 %v5183_v5  ;;  %v5270_v4 = vld [vmem:[#allocation5 + $0x7a0] ss:$16 sps:$4 sm:$0xff]   ;;  %v5273_v5 = vld [vmem:[#allocation5 + $0x7a8] ss:$16 sps:$4 sm:$0xff]  }
 0x116   :  { %3322 = vmatprep.subr.bf16.mxu0 %v5188_v6  ;;  %3650 = vmatprep.subr.bf16.mxu1 %v5191_v7  ;;  %v5278_v6 = vld [vmem:[#allocation5 + $0x7c4] ss:$16 sps:$4 sm:$0xff]   ;;  %v5281_v7 = vld [vmem:[#allocation5 + $0x7cc] ss:$16 sps:$4 sm:$0xff]  }
 0x119   :  { %3323 = vmatpush1.bf16.msra.mxu0 %v5186_v8  ;;  %3651 = vmatpush1.bf16.msra.mxu1 %v5189_v9  ;;  %v5276_v8 = vld [vmem:[#allocation5 + $0x7c0] ss:$16 sps:$4 sm:$0xff]   ;;  %v5279_v9 = vld [vmem:[#allocation5 + $0x7c8] ss:$16 sps:$4 sm:$0xff]  }
 0x11a   :  { %3333 = vmatprep.subr.bf16.mxu0 %v5194_v10  ;;  %3661 = vmatprep.subr.bf16.mxu1 %v5197_v12  ;;  %v5284_v10 = vld [vmem:[#allocation5 + $0x7e4] ss:$16 sps:$4 sm:$0xff]   ;;  %v5282_v12 = vld [vmem:[#allocation5 + $0x7e0] ss:$16 sps:$4 sm:$0xff]  }
 0x11c   :  { %3325 = vmatmul.mubr.bf16.vlgmr.msra.gmra.mrb[0].mxu0 %v104_v15  ;;  %3653 = vmatmul.mubr.bf16.vlgmr.msra.gmra.mrb[0].mxu1 %v104_v15  ;;  %v5290_v15 = vld [vmem:[#allocation5 + $0x804] ss:$16 sps:$4 sm:$0xff]  }
 0x11d   :  { %3334 = vmatpush1.bf16.msra.mxu0 %v5192_v13  ;;  %3662 = vmatpush1.bf16.msra.mxu1 %v5195_v14  ;;  %v5285_v13 = vld [vmem:[#allocation5 + $0x7e8] ss:$16 sps:$4 sm:$0xff]   ;;  %v90_v14 = vld [vmem:[#allocation2 + $0x30] sm:$0xff] }
 0x11e   :  { %3335 = vmatprep.subr.bf16.mxu0 %v5200_v17  ;;  %3663 = vmatprep.subr.bf16.mxu1 %v5203_v18  ;;  %v106_v17 = vpack.c.bf16 %v90_v14, %v90_v14  ;;  %v93_v18 = vld [vmem:[#allocation2 + $0x48] sm:$0xff]  ;;  %v5380_v14 = vld [vmem:[#allocation5 + $0x9e4] ss:$16 sps:$4 sm:$0xff]  }
 0x11f   :  { %3365 = vmatprep.mubr.bf16.mxu0 %v107_v19  ;;  %3693 = vmatprep.mubr.bf16.mxu1 %v107_v19  ;;  %v5288_v19 = vld [vmem:[#allocation5 + $0x800] ss:$16 sps:$4 sm:$0xff]  }
 0x121   :  { %3336 = vmatpush1.bf16.msra.mxu0 %v5198_v20  ;;  %3664 = vmatpush1.bf16.msra.mxu1 %v5201_v21  ;;  %v5291_v20 = vld [vmem:[#allocation5 + $0x808] ss:$16 sps:$4 sm:$0xff]   ;;  %v5296_v21 = vld [vmem:[#allocation5 + $0x824] ss:$16 sps:$4 sm:$0xff]  }
 0x122   :  { %3337 = vmatprep.subr.bf16.mxu0 %v5206_v22  ;;  %3665 = vmatprep.subr.bf16.mxu1 %v5209_v23  ;;  %v5299_v22 = vld [vmem:[#allocation5 + $0x82c] ss:$16 sps:$4 sm:$0xff]   ;;  %v109_v23 = vpack.c.bf16 %v93_v18, %v93_v18  ;;  %v5386_v18 = vld [vmem:[#allocation5 + $0xa04] ss:$16 sps:$4 sm:$0xff]  }
 0x125   :  { %3338 = vmatpush1.bf16.msra.mxu0 %v5204_v24  ;;  %3666 = vmatpush1.bf16.msra.mxu1 %v5207_v25  ;;  %v5294_v24 = vld [vmem:[#allocation5 + $0x820] ss:$16 sps:$4 sm:$0xff]   ;;  %v5297_v25 = vld [vmem:[#allocation5 + $0x828] ss:$16 sps:$4 sm:$0xff]  }
 0x126   :  { %3339 = vmatprep.subr.bf16.mxu0 %v5212_v26  ;;  %3667 = vmatprep.subr.bf16.mxu1 %v5215_v27  ;;  %v5302_v26 = vld [vmem:[#allocation5 + $0x844] ss:$16 sps:$4 sm:$0xff]   ;;  %v5305_v27 = vld [vmem:[#allocation5 + $0x84c] ss:$16 sps:$4 sm:$0xff]  }
 0x129   :  { %3340 = vmatpush1.bf16.msra.mxu0 %v5210_v28  ;;  %3668 = vmatpush1.bf16.msra.mxu1 %v5213_v29  ;;  %v5300_v28 = vld [vmem:[#allocation5 + $0x840] ss:$16 sps:$4 sm:$0xff]   ;;  %v5303_v29 = vld [vmem:[#allocation5 + $0x848] ss:$16 sps:$4 sm:$0xff]  }
 0x12a   :  { %3341 = vmatprep.subr.bf16.mxu0 %v5218_v30  ;;  %3669 = vmatprep.subr.bf16.mxu1 %v5221_v31  ;;  %v5308_v30 = vld [vmem:[#allocation5 + $0x864] ss:$16 sps:$4 sm:$0xff]   ;;  %v5311_v31 = vld [vmem:[#allocation5 + $0x86c] ss:$16 sps:$4 sm:$0xff]  }
 0x12d   :  { %3342 = vmatpush1.bf16.msra.mxu0 %v5216_v32  ;;  %3670 = vmatpush1.bf16.msra.mxu1 %v5219_v33  ;;  %v5306_v32 = vld [vmem:[#allocation5 + $0x860] ss:$16 sps:$4 sm:$0xff]   ;;  %v5309_v33 = vld [vmem:[#allocation5 + $0x868] ss:$16 sps:$4 sm:$0xff]  }
 0x12e   :  { %3343 = vmatprep.subr.bf16.mxu0 %v5224_v34  ;;  %3671 = vmatprep.subr.bf16.mxu1 %v5227_v35  ;;  %v5314_v34 = vld [vmem:[#allocation5 + $0x884] ss:$16 sps:$4 sm:$0xff]   ;;  %v5317_v35 = vld [vmem:[#allocation5 + $0x88c] ss:$16 sps:$4 sm:$0xff]  }
 0x131   :  { %3344 = vmatpush1.bf16.msra.mxu0 %v5222_v36  ;;  %3672 = vmatpush1.bf16.msra.mxu1 %v5225_v37  ;;  %v5312_v36 = vld [vmem:[#allocation5 + $0x880] ss:$16 sps:$4 sm:$0xff]   ;;  %v5315_v37 = vld [vmem:[#allocation5 + $0x888] ss:$16 sps:$4 sm:$0xff]  }
 0x132   :  { %3345 = vmatprep.subr.bf16.mxu0 %v5230_v38  ;;  %3673 = vmatprep.subr.bf16.mxu1 %v5233_v39  ;;  %v5320_v38 = vld [vmem:[#allocation5 + $0x8a4] ss:$16 sps:$4 sm:$0xff]   ;;  %v5323_v39 = vld [vmem:[#allocation5 + $0x8ac] ss:$16 sps:$4 sm:$0xff]  }
 0x135   :  { %3346 = vmatpush1.bf16.msra.mxu0 %v5228_v40  ;;  %3674 = vmatpush1.bf16.msra.mxu1 %v5231_v41  ;;  %v5318_v40 = vld [vmem:[#allocation5 + $0x8a0] ss:$16 sps:$4 sm:$0xff]   ;;  %v5321_v41 = vld [vmem:[#allocation5 + $0x8a8] ss:$16 sps:$4 sm:$0xff]  }
 0x136   :  { %3347 = vmatprep.subr.bf16.mxu0 %v5236_v42  ;;  %3675 = vmatprep.subr.bf16.mxu1 %v5239_v43  ;;  %v5326_v42 = vld [vmem:[#allocation5 + $0x8c4] ss:$16 sps:$4 sm:$0xff]   ;;  %v5329_v43 = vld [vmem:[#allocation5 + $0x8cc] ss:$16 sps:$4 sm:$0xff]  }
 0x139   :  { %3348 = vmatpush1.bf16.msra.mxu0 %v5234_v44  ;;  %3676 = vmatpush1.bf16.msra.mxu1 %v5237_v45  ;;  %v5324_v44 = vld [vmem:[#allocation5 + $0x8c0] ss:$16 sps:$4 sm:$0xff]   ;;  %v5327_v45 = vld [vmem:[#allocation5 + $0x8c8] ss:$16 sps:$4 sm:$0xff]  }
 0x13a   :  { %3349 = vmatprep.subr.bf16.mxu0 %v5242_v46  ;;  %3677 = vmatprep.subr.bf16.mxu1 %v5245_v47  ;;  %v5332_v46 = vld [vmem:[#allocation5 + $0x8e4] ss:$16 sps:$4 sm:$0xff]   ;;  %v5335_v47 = vld [vmem:[#allocation5 + $0x8ec] ss:$16 sps:$4 sm:$0xff]  }
 0x13d   :  { %3350 = vmatpush1.bf16.msra.mxu0 %v5240_v48  ;;  %3678 = vmatpush1.bf16.msra.mxu1 %v5243_v49  ;;  %v5330_v48 = vld [vmem:[#allocation5 + $0x8e0] ss:$16 sps:$4 sm:$0xff]   ;;  %v5333_v49 = vld [vmem:[#allocation5 + $0x8e8] ss:$16 sps:$4 sm:$0xff]  }
 0x13e   :  { %3351 = vmatprep.subr.bf16.mxu0 %v5248_v50  ;;  %3679 = vmatprep.subr.bf16.mxu1 %v5251_v51  ;;  %v5338_v50 = vld [vmem:[#allocation5 + $0x904] ss:$16 sps:$4 sm:$0xff]   ;;  %v5341_v51 = vld [vmem:[#allocation5 + $0x90c] ss:$16 sps:$4 sm:$0xff]  }
 0x141   :  { %3352 = vmatpush1.bf16.msra.mxu0 %v5246_v52  ;;  %3680 = vmatpush1.bf16.msra.mxu1 %v5249_v53  ;;  %v5336_v52 = vld [vmem:[#allocation5 + $0x900] ss:$16 sps:$4 sm:$0xff]   ;;  %v5339_v53 = vld [vmem:[#allocation5 + $0x908] ss:$16 sps:$4 sm:$0xff]  }
 0x142   :  { %3353 = vmatprep.subr.bf16.mxu0 %v5254_v54  ;;  %3681 = vmatprep.subr.bf16.mxu1 %v5257_v55  ;;  %v5344_v54 = vld [vmem:[#allocation5 + $0x924] ss:$16 sps:$4 sm:$0xff]   ;;  %v5347_v55 = vld [vmem:[#allocation5 + $0x92c] ss:$16 sps:$4 sm:$0xff]  }
 0x145   :  { %3354 = vmatpush1.bf16.msra.mxu0 %v5252_v56  ;;  %3682 = vmatpush1.bf16.msra.mxu1 %v5255_v57  ;;  %v5342_v56 = vld [vmem:[#allocation5 + $0x920] ss:$16 sps:$4 sm:$0xff]   ;;  %v5345_v57 = vld [vmem:[#allocation5 + $0x928] ss:$16 sps:$4 sm:$0xff]  }
 0x146   :  { %3355 = vmatprep.subr.bf16.mxu0 %v5260_v58  ;;  %3683 = vmatprep.subr.bf16.mxu1 %v5263_v59  ;;  %v5350_v58 = vld [vmem:[#allocation5 + $0x944] ss:$16 sps:$4 sm:$0xff]   ;;  %v5353_v59 = vld [vmem:[#allocation5 + $0x94c] ss:$16 sps:$4 sm:$0xff]  }
 0x149   :  { %3356 = vmatpush1.bf16.msra.mxu0 %v5258_v60  ;;  %3684 = vmatpush1.bf16.msra.mxu1 %v5261_v61  ;;  %v5348_v60 = vld [vmem:[#allocation5 + $0x940] ss:$16 sps:$4 sm:$0xff]   ;;  %v5351_v61 = vld [vmem:[#allocation5 + $0x948] ss:$16 sps:$4 sm:$0xff]  }
 0x14a   :  { %3357 = vmatprep.subr.bf16.mxu0 %v5266_v62  ;;  %3685 = vmatprep.subr.bf16.mxu1 %v5269_v63  ;;  %v5356_v62 = vld [vmem:[#allocation5 + $0x964] ss:$16 sps:$4 sm:$0xff]   ;;  %v5359_v63 = vld [vmem:[#allocation5 + $0x96c] ss:$16 sps:$4 sm:$0xff]  }
 0x14d   :  { %3358 = vmatpush1.bf16.msra.mxu0 %v5264_v0  ;;  %3686 = vmatpush1.bf16.msra.mxu1 %v5267_v1  ;;  %v5354_v0 = vld [vmem:[#allocation5 + $0x960] ss:$16 sps:$4 sm:$0xff]   ;;  %v5357_v1 = vld [vmem:[#allocation5 + $0x968] ss:$16 sps:$4 sm:$0xff]  }
 0x14e   :  { %3359 = vmatprep.subr.bf16.mxu0 %v5272_v2  ;;  %3687 = vmatprep.subr.bf16.mxu1 %v5275_v3  ;;  %v5362_v2 = vld [vmem:[#allocation5 + $0x984] ss:$16 sps:$4 sm:$0xff]   ;;  %v5365_v3 = vld [vmem:[#allocation5 + $0x98c] ss:$16 sps:$4 sm:$0xff]  }
 0x151   :  { %3360 = vmatpush1.bf16.msra.mxu0 %v5270_v4  ;;  %3688 = vmatpush1.bf16.msra.mxu1 %v5273_v5  ;;  %v5360_v4 = vld [vmem:[#allocation5 + $0x980] ss:$16 sps:$4 sm:$0xff]   ;;  %v5363_v5 = vld [vmem:[#allocation5 + $0x988] ss:$16 sps:$4 sm:$0xff]  }
 0x152   :  { %3361 = vmatprep.subr.bf16.mxu0 %v5278_v6  ;;  %3689 = vmatprep.subr.bf16.mxu1 %v5281_v7  ;;  %v5368_v6 = vld [vmem:[#allocation5 + $0x9a4] ss:$16 sps:$4 sm:$0xff]   ;;  %v5371_v7 = vld [vmem:[#allocation5 + $0x9ac] ss:$16 sps:$4 sm:$0xff]  }
 0x155   :  { %3362 = vmatpush1.bf16.msra.mxu0 %v5276_v8  ;;  %3690 = vmatpush1.bf16.msra.mxu1 %v5279_v9  ;;  %v5366_v8 = vld [vmem:[#allocation5 + $0x9a0] ss:$16 sps:$4 sm:$0xff]   ;;  %v5369_v9 = vld [vmem:[#allocation5 + $0x9a8] ss:$16 sps:$4 sm:$0xff]  }
 0x156   :  { %3363 = vmatprep.subr.bf16.mxu0 %v5284_v10  ;;  %3691 = vmatprep.subr.bf16.mxu1 %v5287_v11  ;;  %v5374_v10 = vld [vmem:[#allocation5 + $0x9c4] ss:$16 sps:$4 sm:$0xff]   ;;  %v5377_v11 = vld [vmem:[#allocation5 + $0x9cc] ss:$16 sps:$4 sm:$0xff]  }
 0x159   :  { %3364 = vmatpush1.bf16.msra.mxu0 %v5282_v12  ;;  %3692 = vmatpush1.bf16.msra.mxu1 %v5285_v13  ;;  %v5372_v12 = vld [vmem:[#allocation5 + $0x9c0] ss:$16 sps:$4 sm:$0xff]   ;;  %v5375_v13 = vld [vmem:[#allocation5 + $0x9c8] ss:$16 sps:$4 sm:$0xff]  }
 0x15a   :  { %3374 = vmatprep.subr.bf16.mxu0 %v5290_v15  ;;  %3702 = vmatprep.subr.bf16.mxu1 %v5293_v16  ;;  %v5383_v15 = vld [vmem:[#allocation5 + $0x9ec] ss:$16 sps:$4 sm:$0xff]   ;;  %v5378_v16 = vld [vmem:[#allocation5 + $0x9e0] ss:$16 sps:$4 sm:$0xff]  }
 0x15c   :  { %3366 = vmatmul.mubr.bf16.vlgmr.msra.gmra.mrb[0].mxu0 %v106_v17  ;;  %3694 = vmatmul.mubr.bf16.vlgmr.msra.gmra.mrb[0].mxu1 %v106_v17  ;;  %v5381_v17 = vld [vmem:[#allocation5 + $0x9e8] ss:$16 sps:$4 sm:$0xff]  }
 0x15d   :  { %3375 = vmatpush1.bf16.msra.mxu0 %v5288_v19  ;;  %3703 = vmatpush1.bf16.msra.mxu1 %v5291_v20  ;;  %v92_v19 = vld [vmem:[#allocation2 + $0x40] sm:$0xff]  ;;  %v5389_v20 = vld [vmem:[#allocation5 + $0xa0c] ss:$16 sps:$4 sm:$0xff]  }
 0x15e   :  { %3376 = vmatprep.subr.bf16.mxu0 %v5296_v21  ;;  %3704 = vmatprep.subr.bf16.mxu1 %v5299_v22  ;;  %v95_v21 = vld [vmem:[#allocation2 + $0x58] sm:$0xff]  ;;  %v108_v22 = vpack.c.bf16 %v92_v19, %v92_v19 }
 0x15f   :  { %3406 = vmatprep.mubr.bf16.mxu0 %v109_v23  ;;  %3734 = vmatprep.mubr.bf16.mxu1 %v109_v23  ;;  %v5384_v23 = vld [vmem:[#allocation5 + $0xa00] ss:$16 sps:$4 sm:$0xff]   ;;  %v5479_v19 = vld [vmem:[#allocation5 + $0xbec] ss:$16 sps:$4 sm:$0xff]  }
 0x161   :  { %3377 = vmatpush1.bf16.msra.mxu0 %v5294_v24  ;;  %3705 = vmatpush1.bf16.msra.mxu1 %v5297_v25  ;;  %v5387_v24 = vld [vmem:[#allocation5 + $0xa08] ss:$16 sps:$4 sm:$0xff]   ;;  %v5392_v25 = vld [vmem:[#allocation5 + $0xa24] ss:$16 sps:$4 sm:$0xff]  }
 0x162   :  { %3378 = vmatprep.subr.bf16.mxu0 %v5302_v26  ;;  %3706 = vmatprep.subr.bf16.mxu1 %v5305_v27  ;;  %v5395_v26 = vld [vmem:[#allocation5 + $0xa2c] ss:$16 sps:$4 sm:$0xff]   ;;  %v111_v27 = vpack.c.bf16 %v95_v21, %v95_v21  ;;  %v5477_v21 = vld [vmem:[#allocation5 + $0xbe8] ss:$16 sps:$4 sm:$0xff]  }
 0x165   :  { %3379 = vmatpush1.bf16.msra.mxu0 %v5300_v28  ;;  %3707 = vmatpush1.bf16.msra.mxu1 %v5303_v29  ;;  %v5390_v28 = vld [vmem:[#allocation5 + $0xa20] ss:$16 sps:$4 sm:$0xff]   ;;  %v5393_v29 = vld [vmem:[#allocation5 + $0xa28] ss:$16 sps:$4 sm:$0xff]  }
 0x166   :  { %3380 = vmatprep.subr.bf16.mxu0 %v5308_v30  ;;  %3708 = vmatprep.subr.bf16.mxu1 %v5311_v31  ;;  %v5398_v30 = vld [vmem:[#allocation5 + $0xa44] ss:$16 sps:$4 sm:$0xff]   ;;  %v5401_v31 = vld [vmem:[#allocation5 + $0xa4c] ss:$16 sps:$4 sm:$0xff]  }
 0x169   :  { %3381 = vmatpush1.bf16.msra.mxu0 %v5306_v32  ;;  %3709 = vmatpush1.bf16.msra.mxu1 %v5309_v33  ;;  %v5396_v32 = vld [vmem:[#allocation5 + $0xa40] ss:$16 sps:$4 sm:$0xff]   ;;  %v5399_v33 = vld [vmem:[#allocation5 + $0xa48] ss:$16 sps:$4 sm:$0xff]  }
 0x16a   :  { %3382 = vmatprep.subr.bf16.mxu0 %v5314_v34  ;;  %3710 = vmatprep.subr.bf16.mxu1 %v5317_v35  ;;  %v5404_v34 = vld [vmem:[#allocation5 + $0xa64] ss:$16 sps:$4 sm:$0xff]   ;;  %v5407_v35 = vld [vmem:[#allocation5 + $0xa6c] ss:$16 sps:$4 sm:$0xff]  }
 0x16d   :  { %3383 = vmatpush1.bf16.msra.mxu0 %v5312_v36  ;;  %3711 = vmatpush1.bf16.msra.mxu1 %v5315_v37  ;;  %v5402_v36 = vld [vmem:[#allocation5 + $0xa60] ss:$16 sps:$4 sm:$0xff]   ;;  %v5405_v37 = vld [vmem:[#allocation5 + $0xa68] ss:$16 sps:$4 sm:$0xff]  }
 0x16e   :  { %3384 = vmatprep.subr.bf16.mxu0 %v5320_v38  ;;  %3712 = vmatprep.subr.bf16.mxu1 %v5323_v39  ;;  %v5410_v38 = vld [vmem:[#allocation5 + $0xa84] ss:$16 sps:$4 sm:$0xff]   ;;  %v5413_v39 = vld [vmem:[#allocation5 + $0xa8c] ss:$16 sps:$4 sm:$0xff]  }
 0x171   :  { %3385 = vmatpush1.bf16.msra.mxu0 %v5318_v40  ;;  %3713 = vmatpush1.bf16.msra.mxu1 %v5321_v41  ;;  %v5408_v40 = vld [vmem:[#allocation5 + $0xa80] ss:$16 sps:$4 sm:$0xff]   ;;  %v5411_v41 = vld [vmem:[#allocation5 + $0xa88] ss:$16 sps:$4 sm:$0xff]  }
 0x172   :  { %3386 = vmatprep.subr.bf16.mxu0 %v5326_v42  ;;  %3714 = vmatprep.subr.bf16.mxu1 %v5329_v43  ;;  %v5416_v42 = vld [vmem:[#allocation5 + $0xaa4] ss:$16 sps:$4 sm:$0xff]   ;;  %v5419_v43 = vld [vmem:[#allocation5 + $0xaac] ss:$16 sps:$4 sm:$0xff]  }
 0x175   :  { %3387 = vmatpush1.bf16.msra.mxu0 %v5324_v44  ;;  %3715 = vmatpush1.bf16.msra.mxu1 %v5327_v45  ;;  %v5414_v44 = vld [vmem:[#allocation5 + $0xaa0] ss:$16 sps:$4 sm:$0xff]   ;;  %v5417_v45 = vld [vmem:[#allocation5 + $0xaa8] ss:$16 sps:$4 sm:$0xff]  }
 0x176   :  { %3388 = vmatprep.subr.bf16.mxu0 %v5332_v46  ;;  %3716 = vmatprep.subr.bf16.mxu1 %v5335_v47  ;;  %v5422_v46 = vld [vmem:[#allocation5 + $0xac4] ss:$16 sps:$4 sm:$0xff]   ;;  %v5425_v47 = vld [vmem:[#allocation5 + $0xacc] ss:$16 sps:$4 sm:$0xff]  }
 0x179   :  { %3389 = vmatpush1.bf16.msra.mxu0 %v5330_v48  ;;  %3717 = vmatpush1.bf16.msra.mxu1 %v5333_v49  ;;  %v5420_v48 = vld [vmem:[#allocation5 + $0xac0] ss:$16 sps:$4 sm:$0xff]   ;;  %v5423_v49 = vld [vmem:[#allocation5 + $0xac8] ss:$16 sps:$4 sm:$0xff]  }
 0x17a   :  { %3390 = vmatprep.subr.bf16.mxu0 %v5338_v50  ;;  %3718 = vmatprep.subr.bf16.mxu1 %v5341_v51  ;;  %v5428_v50 = vld [vmem:[#allocation5 + $0xae4] ss:$16 sps:$4 sm:$0xff]   ;;  %v5431_v51 = vld [vmem:[#allocation5 + $0xaec] ss:$16 sps:$4 sm:$0xff]  }
 0x17d   :  { %3391 = vmatpush1.bf16.msra.mxu0 %v5336_v52  ;;  %3719 = vmatpush1.bf16.msra.mxu1 %v5339_v53  ;;  %v5426_v52 = vld [vmem:[#allocation5 + $0xae0] ss:$16 sps:$4 sm:$0xff]   ;;  %v5429_v53 = vld [vmem:[#allocation5 + $0xae8] ss:$16 sps:$4 sm:$0xff]  }
 0x17e   :  { %3392 = vmatprep.subr.bf16.mxu0 %v5344_v54  ;;  %3720 = vmatprep.subr.bf16.mxu1 %v5347_v55  ;;  %v5434_v54 = vld [vmem:[#allocation5 + $0xb04] ss:$16 sps:$4 sm:$0xff]   ;;  %v5437_v55 = vld [vmem:[#allocation5 + $0xb0c] ss:$16 sps:$4 sm:$0xff]  }
 0x181   :  { %3393 = vmatpush1.bf16.msra.mxu0 %v5342_v56  ;;  %3721 = vmatpush1.bf16.msra.mxu1 %v5345_v57  ;;  %v5432_v56 = vld [vmem:[#allocation5 + $0xb00] ss:$16 sps:$4 sm:$0xff]   ;;  %v5435_v57 = vld [vmem:[#allocation5 + $0xb08] ss:$16 sps:$4 sm:$0xff]  }
 0x182   :  { %3394 = vmatprep.subr.bf16.mxu0 %v5350_v58  ;;  %3722 = vmatprep.subr.bf16.mxu1 %v5353_v59  ;;  %v5440_v58 = vld [vmem:[#allocation5 + $0xb24] ss:$16 sps:$4 sm:$0xff]   ;;  %v5443_v59 = vld [vmem:[#allocation5 + $0xb2c] ss:$16 sps:$4 sm:$0xff]  }
 0x185   :  { %3395 = vmatpush1.bf16.msra.mxu0 %v5348_v60  ;;  %3723 = vmatpush1.bf16.msra.mxu1 %v5351_v61  ;;  %v5438_v60 = vld [vmem:[#allocation5 + $0xb20] ss:$16 sps:$4 sm:$0xff]   ;;  %v5441_v61 = vld [vmem:[#allocation5 + $0xb28] ss:$16 sps:$4 sm:$0xff]  }
 0x186   :  { %3396 = vmatprep.subr.bf16.mxu0 %v5356_v62  ;;  %3724 = vmatprep.subr.bf16.mxu1 %v5359_v63  ;;  %v5446_v62 = vld [vmem:[#allocation5 + $0xb44] ss:$16 sps:$4 sm:$0xff]   ;;  %v5449_v63 = vld [vmem:[#allocation5 + $0xb4c] ss:$16 sps:$4 sm:$0xff]  }
 0x189   :  { %3397 = vmatpush1.bf16.msra.mxu0 %v5354_v0  ;;  %3725 = vmatpush1.bf16.msra.mxu1 %v5357_v1  ;;  %v5444_v0 = vld [vmem:[#allocation5 + $0xb40] ss:$16 sps:$4 sm:$0xff]   ;;  %v5447_v1 = vld [vmem:[#allocation5 + $0xb48] ss:$16 sps:$4 sm:$0xff]  }
 0x18a   :  { %3398 = vmatprep.subr.bf16.mxu0 %v5362_v2  ;;  %3726 = vmatprep.subr.bf16.mxu1 %v5365_v3  ;;  %v5452_v2 = vld [vmem:[#allocation5 + $0xb64] ss:$16 sps:$4 sm:$0xff]   ;;  %v5455_v3 = vld [vmem:[#allocation5 + $0xb6c] ss:$16 sps:$4 sm:$0xff]  }
 0x18d   :  { %3399 = vmatpush1.bf16.msra.mxu0 %v5360_v4  ;;  %3727 = vmatpush1.bf16.msra.mxu1 %v5363_v5  ;;  %v5450_v4 = vld [vmem:[#allocation5 + $0xb60] ss:$16 sps:$4 sm:$0xff]   ;;  %v5453_v5 = vld [vmem:[#allocation5 + $0xb68] ss:$16 sps:$4 sm:$0xff]  }
 0x18e   :  { %3400 = vmatprep.subr.bf16.mxu0 %v5368_v6  ;;  %3728 = vmatprep.subr.bf16.mxu1 %v5371_v7  ;;  %v5458_v6 = vld [vmem:[#allocation5 + $0xb84] ss:$16 sps:$4 sm:$0xff]   ;;  %v5461_v7 = vld [vmem:[#allocation5 + $0xb8c] ss:$16 sps:$4 sm:$0xff]  }
 0x191   :  { %3401 = vmatpush1.bf16.msra.mxu0 %v5366_v8  ;;  %3729 = vmatpush1.bf16.msra.mxu1 %v5369_v9  ;;  %v5456_v8 = vld [vmem:[#allocation5 + $0xb80] ss:$16 sps:$4 sm:$0xff]   ;;  %v5459_v9 = vld [vmem:[#allocation5 + $0xb88] ss:$16 sps:$4 sm:$0xff]  }
 0x192   :  { %3402 = vmatprep.subr.bf16.mxu0 %v5374_v10  ;;  %3730 = vmatprep.subr.bf16.mxu1 %v5377_v11  ;;  %v5464_v10 = vld [vmem:[#allocation5 + $0xba4] ss:$16 sps:$4 sm:$0xff]   ;;  %v5467_v11 = vld [vmem:[#allocation5 + $0xbac] ss:$16 sps:$4 sm:$0xff]  }
 0x195   :  { %3403 = vmatpush1.bf16.msra.mxu0 %v5372_v12  ;;  %3731 = vmatpush1.bf16.msra.mxu1 %v5375_v13  ;;  %v5462_v12 = vld [vmem:[#allocation5 + $0xba0] ss:$16 sps:$4 sm:$0xff]   ;;  %v5465_v13 = vld [vmem:[#allocation5 + $0xba8] ss:$16 sps:$4 sm:$0xff]  }
 0x196   :  { %3404 = vmatprep.subr.bf16.mxu0 %v5380_v14  ;;  %3732 = vmatprep.subr.bf16.mxu1 %v5383_v15  ;;  %v5470_v14 = vld [vmem:[#allocation5 + $0xbc4] ss:$16 sps:$4 sm:$0xff]   ;;  %v5473_v15 = vld [vmem:[#allocation5 + $0xbcc] ss:$16 sps:$4 sm:$0xff]  }
 0x199   :  { %3405 = vmatpush1.bf16.msra.mxu0 %v5378_v16  ;;  %3733 = vmatpush1.bf16.msra.mxu1 %v5381_v17  ;;  %v5468_v16 = vld [vmem:[#allocation5 + $0xbc0] ss:$16 sps:$4 sm:$0xff]   ;;  %v5471_v17 = vld [vmem:[#allocation5 + $0xbc8] ss:$16 sps:$4 sm:$0xff]  }
 0x19a   :  { %3415 = vmatprep.subr.bf16.mxu0 %v5386_v18  ;;  %3743 = vmatprep.subr.bf16.mxu1 %v5389_v20  ;;  %v5476_v18 = vld [vmem:[#allocation5 + $0xbe4] ss:$16 sps:$4 sm:$0xff]   ;;  %v5474_v20 = vld [vmem:[#allocation5 + $0xbe0] ss:$16 sps:$4 sm:$0xff]  }
 0x19c   :  { %3407 = vmatmul.mubr.bf16.vlgmr.msra.gmra.mrb[0].mxu0 %v108_v22  ;;  %3735 = vmatmul.mubr.bf16.vlgmr.msra.gmra.mrb[0].mxu1 %v108_v22  ;;  %v94_v22 = vld [vmem:[#allocation2 + $0x50] sm:$0xff] }
 0x19d   :  { %3416 = vmatpush1.bf16.msra.mxu0 %v5384_v23  ;;  %3744 = vmatpush1.bf16.msra.mxu1 %v5387_v24  ;;  %v5482_v23 = vld [vmem:[#allocation5 + $0xc04] ss:$16 sps:$4 sm:$0xff]   ;;  %v5485_v24 = vld [vmem:[#allocation5 + $0xc0c] ss:$16 sps:$4 sm:$0xff]  }
 0x19e   :  { %3417 = vmatprep.subr.bf16.mxu0 %v5392_v25  ;;  %3745 = vmatprep.subr.bf16.mxu1 %v5395_v26  ;;  %v110_v25 = vpack.c.bf16 %v94_v22, %v94_v22  ;;  %v97_v26 = vld [vmem:[#allocation2 + $0x68] sm:$0xff]  ;;  %v5572_v22 = vld [vmem:[#allocation5 + $0xde4] ss:$16 sps:$4 sm:$0xff]  }
 0x19f   :  { %3447 = vmatprep.mubr.bf16.mxu0 %v111_v27  ;;  %3775 = vmatprep.mubr.bf16.mxu1 %v111_v27  ;;  %v5480_v27 = vld [vmem:[#allocation5 + $0xc00] ss:$16 sps:$4 sm:$0xff]  }
 0x1a1   :  { %3418 = vmatpush1.bf16.msra.mxu0 %v5390_v28  ;;  %3746 = vmatpush1.bf16.msra.mxu1 %v5393_v29  ;;  %v5483_v28 = vld [vmem:[#allocation5 + $0xc08] ss:$16 sps:$4 sm:$0xff]   ;;  %v5488_v29 = vld [vmem:[#allocation5 + $0xc24] ss:$16 sps:$4 sm:$0xff]  }
 0x1a2   :  { %3419 = vmatprep.subr.bf16.mxu0 %v5398_v30  ;;  %3747 = vmatprep.subr.bf16.mxu1 %v5401_v31  ;;  %v5491_v30 = vld [vmem:[#allocation5 + $0xc2c] ss:$16 sps:$4 sm:$0xff]   ;;  %v113_v31 = vpack.c.bf16 %v97_v26, %v97_v26  ;;  %v96_v26 = vld [vmem:[#allocation2 + $0x60] sm:$0xff] }
 0x1a5   :  { %3420 = vmatpush1.bf16.msra.mxu0 %v5396_v32  ;;  %3748 = vmatpush1.bf16.msra.mxu1 %v5399_v33  ;;  %v5486_v32 = vld [vmem:[#allocation5 + $0xc20] ss:$16 sps:$4 sm:$0xff]   ;;  %v5489_v33 = vld [vmem:[#allocation5 + $0xc28] ss:$16 sps:$4 sm:$0xff]  }
 0x1a6   :  { %3421 = vmatprep.subr.bf16.mxu0 %v5404_v34  ;;  %3749 = vmatprep.subr.bf16.mxu1 %v5407_v35  ;;  %v5494_v34 = vld [vmem:[#allocation5 + $0xc44] ss:$16 sps:$4 sm:$0xff]   ;;  %v5497_v35 = vld [vmem:[#allocation5 + $0xc4c] ss:$16 sps:$4 sm:$0xff]  }
 0x1a9   :  { %3422 = vmatpush1.bf16.msra.mxu0 %v5402_v36  ;;  %3750 = vmatpush1.bf16.msra.mxu1 %v5405_v37  ;;  %v5492_v36 = vld [vmem:[#allocation5 + $0xc40] ss:$16 sps:$4 sm:$0xff]   ;;  %v5495_v37 = vld [vmem:[#allocation5 + $0xc48] ss:$16 sps:$4 sm:$0xff]  }
 0x1aa   :  { %3423 = vmatprep.subr.bf16.mxu0 %v5410_v38  ;;  %3751 = vmatprep.subr.bf16.mxu1 %v5413_v39  ;;  %v5500_v38 = vld [vmem:[#allocation5 + $0xc64] ss:$16 sps:$4 sm:$0xff]   ;;  %v5503_v39 = vld [vmem:[#allocation5 + $0xc6c] ss:$16 sps:$4 sm:$0xff]  }
 0x1ad   :  { %3424 = vmatpush1.bf16.msra.mxu0 %v5408_v40  ;;  %3752 = vmatpush1.bf16.msra.mxu1 %v5411_v41  ;;  %v5498_v40 = vld [vmem:[#allocation5 + $0xc60] ss:$16 sps:$4 sm:$0xff]   ;;  %v5501_v41 = vld [vmem:[#allocation5 + $0xc68] ss:$16 sps:$4 sm:$0xff]  }
 0x1ae   :  { %3425 = vmatprep.subr.bf16.mxu0 %v5416_v42  ;;  %3753 = vmatprep.subr.bf16.mxu1 %v5419_v43  ;;  %v5506_v42 = vld [vmem:[#allocation5 + $0xc84] ss:$16 sps:$4 sm:$0xff]   ;;  %v5509_v43 = vld [vmem:[#allocation5 + $0xc8c] ss:$16 sps:$4 sm:$0xff]  }
 0x1b1   :  { %3426 = vmatpush1.bf16.msra.mxu0 %v5414_v44  ;;  %3754 = vmatpush1.bf16.msra.mxu1 %v5417_v45  ;;  %v5504_v44 = vld [vmem:[#allocation5 + $0xc80] ss:$16 sps:$4 sm:$0xff]   ;;  %v5507_v45 = vld [vmem:[#allocation5 + $0xc88] ss:$16 sps:$4 sm:$0xff]  }
 0x1b2   :  { %3427 = vmatprep.subr.bf16.mxu0 %v5422_v46  ;;  %3755 = vmatprep.subr.bf16.mxu1 %v5425_v47  ;;  %v5512_v46 = vld [vmem:[#allocation5 + $0xca4] ss:$16 sps:$4 sm:$0xff]   ;;  %v5515_v47 = vld [vmem:[#allocation5 + $0xcac] ss:$16 sps:$4 sm:$0xff]  }
 0x1b5   :  { %3428 = vmatpush1.bf16.msra.mxu0 %v5420_v48  ;;  %3756 = vmatpush1.bf16.msra.mxu1 %v5423_v49  ;;  %v5510_v48 = vld [vmem:[#allocation5 + $0xca0] ss:$16 sps:$4 sm:$0xff]   ;;  %v5513_v49 = vld [vmem:[#allocation5 + $0xca8] ss:$16 sps:$4 sm:$0xff]  }
 0x1b6   :  { %3429 = vmatprep.subr.bf16.mxu0 %v5428_v50  ;;  %3757 = vmatprep.subr.bf16.mxu1 %v5431_v51  ;;  %v5518_v50 = vld [vmem:[#allocation5 + $0xcc4] ss:$16 sps:$4 sm:$0xff]   ;;  %v5521_v51 = vld [vmem:[#allocation5 + $0xccc] ss:$16 sps:$4 sm:$0xff]  }
 0x1b9   :  { %3430 = vmatpush1.bf16.msra.mxu0 %v5426_v52  ;;  %3758 = vmatpush1.bf16.msra.mxu1 %v5429_v53  ;;  %v5516_v52 = vld [vmem:[#allocation5 + $0xcc0] ss:$16 sps:$4 sm:$0xff]   ;;  %v5519_v53 = vld [vmem:[#allocation5 + $0xcc8] ss:$16 sps:$4 sm:$0xff]  }
 0x1ba   :  { %3431 = vmatprep.subr.bf16.mxu0 %v5434_v54  ;;  %3759 = vmatprep.subr.bf16.mxu1 %v5437_v55  ;;  %v5524_v54 = vld [vmem:[#allocation5 + $0xce4] ss:$16 sps:$4 sm:$0xff]   ;;  %v5527_v55 = vld [vmem:[#allocation5 + $0xcec] ss:$16 sps:$4 sm:$0xff]  }
 0x1bd   :  { %3432 = vmatpush1.bf16.msra.mxu0 %v5432_v56  ;;  %3760 = vmatpush1.bf16.msra.mxu1 %v5435_v57  ;;  %v5522_v56 = vld [vmem:[#allocation5 + $0xce0] ss:$16 sps:$4 sm:$0xff]   ;;  %v5525_v57 = vld [vmem:[#allocation5 + $0xce8] ss:$16 sps:$4 sm:$0xff]  }
 0x1be   :  { %3433 = vmatprep.subr.bf16.mxu0 %v5440_v58  ;;  %3761 = vmatprep.subr.bf16.mxu1 %v5443_v59  ;;  %v5530_v58 = vld [vmem:[#allocation5 + $0xd04] ss:$16 sps:$4 sm:$0xff]   ;;  %v5533_v59 = vld [vmem:[#allocation5 + $0xd0c] ss:$16 sps:$4 sm:$0xff]  }
 0x1c1   :  { %3434 = vmatpush1.bf16.msra.mxu0 %v5438_v60  ;;  %3762 = vmatpush1.bf16.msra.mxu1 %v5441_v61  ;;  %v5528_v60 = vld [vmem:[#allocation5 + $0xd00] ss:$16 sps:$4 sm:$0xff]   ;;  %v5531_v61 = vld [vmem:[#allocation5 + $0xd08] ss:$16 sps:$4 sm:$0xff]  }
 0x1c2   :  { %3435 = vmatprep.subr.bf16.mxu0 %v5446_v62  ;;  %3763 = vmatprep.subr.bf16.mxu1 %v5449_v63  ;;  %v5536_v62 = vld [vmem:[#allocation5 + $0xd24] ss:$16 sps:$4 sm:$0xff]   ;;  %v5539_v63 = vld [vmem:[#allocation5 + $0xd2c] ss:$16 sps:$4 sm:$0xff]  }
 0x1c5   :  { %3436 = vmatpush1.bf16.msra.mxu0 %v5444_v0  ;;  %3764 = vmatpush1.bf16.msra.mxu1 %v5447_v1  ;;  %v5534_v0 = vld [vmem:[#allocation5 + $0xd20] ss:$16 sps:$4 sm:$0xff]   ;;  %v5537_v1 = vld [vmem:[#allocation5 + $0xd28] ss:$16 sps:$4 sm:$0xff]  }
 0x1c6   :  { %3437 = vmatprep.subr.bf16.mxu0 %v5452_v2  ;;  %3765 = vmatprep.subr.bf16.mxu1 %v5455_v3  ;;  %v5542_v2 = vld [vmem:[#allocation5 + $0xd44] ss:$16 sps:$4 sm:$0xff]   ;;  %v5545_v3 = vld [vmem:[#allocation5 + $0xd4c] ss:$16 sps:$4 sm:$0xff]  }
 0x1c9   :  { %3438 = vmatpush1.bf16.msra.mxu0 %v5450_v4  ;;  %3766 = vmatpush1.bf16.msra.mxu1 %v5453_v5  ;;  %v5540_v4 = vld [vmem:[#allocation5 + $0xd40] ss:$16 sps:$4 sm:$0xff]   ;;  %v5543_v5 = vld [vmem:[#allocation5 + $0xd48] ss:$16 sps:$4 sm:$0xff]  }
 0x1ca   :  { %3439 = vmatprep.subr.bf16.mxu0 %v5458_v6  ;;  %3767 = vmatprep.subr.bf16.mxu1 %v5461_v7  ;;  %v5548_v6 = vld [vmem:[#allocation5 + $0xd64] ss:$16 sps:$4 sm:$0xff]   ;;  %v5551_v7 = vld [vmem:[#allocation5 + $0xd6c] ss:$16 sps:$4 sm:$0xff]  }
 0x1cd   :  { %3440 = vmatpush1.bf16.msra.mxu0 %v5456_v8  ;;  %3768 = vmatpush1.bf16.msra.mxu1 %v5459_v9  ;;  %v5546_v8 = vld [vmem:[#allocation5 + $0xd60] ss:$16 sps:$4 sm:$0xff]   ;;  %v5549_v9 = vld [vmem:[#allocation5 + $0xd68] ss:$16 sps:$4 sm:$0xff]  }
 0x1ce   :  { %3441 = vmatprep.subr.bf16.mxu0 %v5464_v10  ;;  %3769 = vmatprep.subr.bf16.mxu1 %v5467_v11  ;;  %v5554_v10 = vld [vmem:[#allocation5 + $0xd84] ss:$16 sps:$4 sm:$0xff]   ;;  %v5557_v11 = vld [vmem:[#allocation5 + $0xd8c] ss:$16 sps:$4 sm:$0xff]  }
 0x1d1   :  { %3442 = vmatpush1.bf16.msra.mxu0 %v5462_v12  ;;  %3770 = vmatpush1.bf16.msra.mxu1 %v5465_v13  ;;  %v5552_v12 = vld [vmem:[#allocation5 + $0xd80] ss:$16 sps:$4 sm:$0xff]   ;;  %v5555_v13 = vld [vmem:[#allocation5 + $0xd88] ss:$16 sps:$4 sm:$0xff]  }
 0x1d2   :  { %3443 = vmatprep.subr.bf16.mxu0 %v5470_v14  ;;  %3771 = vmatprep.subr.bf16.mxu1 %v5473_v15  ;;  %v5560_v14 = vld [vmem:[#allocation5 + $0xda4] ss:$16 sps:$4 sm:$0xff]   ;;  %v5563_v15 = vld [vmem:[#allocation5 + $0xdac] ss:$16 sps:$4 sm:$0xff]  }
 0x1d5   :  { %3444 = vmatpush1.bf16.msra.mxu0 %v5468_v16  ;;  %3772 = vmatpush1.bf16.msra.mxu1 %v5471_v17  ;;  %v5558_v16 = vld [vmem:[#allocation5 + $0xda0] ss:$16 sps:$4 sm:$0xff]   ;;  %v5561_v17 = vld [vmem:[#allocation5 + $0xda8] ss:$16 sps:$4 sm:$0xff]  }
 0x1d6   :  { %3445 = vmatprep.subr.bf16.mxu0 %v5476_v18  ;;  %3773 = vmatprep.subr.bf16.mxu1 %v5479_v19  ;;  %v5566_v18 = vld [vmem:[#allocation5 + $0xdc4] ss:$16 sps:$4 sm:$0xff]   ;;  %v5569_v19 = vld [vmem:[#allocation5 + $0xdcc] ss:$16 sps:$4 sm:$0xff]  }
 0x1d9   :  { %3446 = vmatpush1.bf16.msra.mxu0 %v5474_v20  ;;  %3774 = vmatpush1.bf16.msra.mxu1 %v5477_v21  ;;  %v5564_v20 = vld [vmem:[#allocation5 + $0xdc0] ss:$16 sps:$4 sm:$0xff]   ;;  %v5567_v21 = vld [vmem:[#allocation5 + $0xdc8] ss:$16 sps:$4 sm:$0xff]  }
 0x1da   :  { %3456 = vmatprep.subr.bf16.mxu0 %v5482_v23  ;;  %3784 = vmatprep.subr.bf16.mxu1 %v5485_v24  ;;  %v5575_v23 = vld [vmem:[#allocation5 + $0xdec] ss:$16 sps:$4 sm:$0xff]   ;;  %v5570_v24 = vld [vmem:[#allocation5 + $0xde0] ss:$16 sps:$4 sm:$0xff]  }
 0x1dc   :  { %3448 = vmatmul.mubr.bf16.vlgmr.msra.gmra.mrb[0].mxu0 %v110_v25  ;;  %3776 = vmatmul.mubr.bf16.vlgmr.msra.gmra.mrb[0].mxu1 %v110_v25  ;;  %v5573_v25 = vld [vmem:[#allocation5 + $0xde8] ss:$16 sps:$4 sm:$0xff]  }
 0x1dd   :  { %3457 = vmatpush1.bf16.msra.mxu0 %v5480_v27  ;;  %3785 = vmatpush1.bf16.msra.mxu1 %v5483_v28  ;;  %v5578_v27 = vld [vmem:[#allocation5 + $0xe04] ss:$16 sps:$4 sm:$0xff]   ;;  %v5581_v28 = vld [vmem:[#allocation5 + $0xe0c] ss:$16 sps:$4 sm:$0xff]  }
 0x1de   :  { %3458 = vmatprep.subr.bf16.mxu0 %v5488_v29  ;;  %3786 = vmatprep.subr.bf16.mxu1 %v5491_v30  ;;  %v112_v29 = vpack.c.bf16 %v96_v26, %v96_v26  ;;  %v99_v30 = vld [vmem:[#allocation2 + $0x78] sm:$0xff]  ;;  %v5668_v26 = vld [vmem:[#allocation5 + $0xfe4] ss:$16 sps:$4 sm:$0xff]  }
 0x1df   :  { %3488 = vmatprep.mubr.bf16.mxu0 %v113_v31  ;;  %3816 = vmatprep.mubr.bf16.mxu1 %v113_v31  ;;  %v5576_v31 = vld [vmem:[#allocation5 + $0xe00] ss:$16 sps:$4 sm:$0xff]  }
 0x1e1   :  { %3459 = vmatpush1.bf16.msra.mxu0 %v5486_v32  ;;  %3787 = vmatpush1.bf16.msra.mxu1 %v5489_v33  ;;  %v5579_v32 = vld [vmem:[#allocation5 + $0xe08] ss:$16 sps:$4 sm:$0xff]   ;;  %v5584_v33 = vld [vmem:[#allocation5 + $0xe24] ss:$16 sps:$4 sm:$0xff]  }
 0x1e2   :  { %3460 = vmatprep.subr.bf16.mxu0 %v5494_v34  ;;  %3788 = vmatprep.subr.bf16.mxu1 %v5497_v35  ;;  %v5587_v34 = vld [vmem:[#allocation5 + $0xe2c] ss:$16 sps:$4 sm:$0xff]   ;;  %v115_v35 = vpack.c.bf16 %v99_v30, %v99_v30  ;;  %v98_v30 = vld [vmem:[#allocation2 + $0x70] sm:$0xff] }
 0x1e5   :  { %3461 = vmatpush1.bf16.msra.mxu0 %v5492_v36  ;;  %3789 = vmatpush1.bf16.msra.mxu1 %v5495_v37  ;;  %v5582_v36 = vld [vmem:[#allocation5 + $0xe20] ss:$16 sps:$4 sm:$0xff]   ;;  %v5585_v37 = vld [vmem:[#allocation5 + $0xe28] ss:$16 sps:$4 sm:$0xff]  }
 0x1e6   :  { %3462 = vmatprep.subr.bf16.mxu0 %v5500_v38  ;;  %3790 = vmatprep.subr.bf16.mxu1 %v5503_v39  ;;  %v5590_v38 = vld [vmem:[#allocation5 + $0xe44] ss:$16 sps:$4 sm:$0xff]   ;;  %v5593_v39 = vld [vmem:[#allocation5 + $0xe4c] ss:$16 sps:$4 sm:$0xff]  }
 0x1e9   :  { %3463 = vmatpush1.bf16.msra.mxu0 %v5498_v40  ;;  %3791 = vmatpush1.bf16.msra.mxu1 %v5501_v41  ;;  %v5588_v40 = vld [vmem:[#allocation5 + $0xe40] ss:$16 sps:$4 sm:$0xff]   ;;  %v5591_v41 = vld [vmem:[#allocation5 + $0xe48] ss:$16 sps:$4 sm:$0xff]  }
 0x1ea   :  { %3464 = vmatprep.subr.bf16.mxu0 %v5506_v42  ;;  %3792 = vmatprep.subr.bf16.mxu1 %v5509_v43  ;;  %v5596_v42 = vld [vmem:[#allocation5 + $0xe64] ss:$16 sps:$4 sm:$0xff]   ;;  %v5599_v43 = vld [vmem:[#allocation5 + $0xe6c] ss:$16 sps:$4 sm:$0xff]  }
 0x1ed   :  { %3465 = vmatpush1.bf16.msra.mxu0 %v5504_v44  ;;  %3793 = vmatpush1.bf16.msra.mxu1 %v5507_v45  ;;  %v5594_v44 = vld [vmem:[#allocation5 + $0xe60] ss:$16 sps:$4 sm:$0xff]   ;;  %v5597_v45 = vld [vmem:[#allocation5 + $0xe68] ss:$16 sps:$4 sm:$0xff]  }
 0x1ee   :  { %3466 = vmatprep.subr.bf16.mxu0 %v5512_v46  ;;  %3794 = vmatprep.subr.bf16.mxu1 %v5515_v47  ;;  %v5602_v46 = vld [vmem:[#allocation5 + $0xe84] ss:$16 sps:$4 sm:$0xff]   ;;  %v5605_v47 = vld [vmem:[#allocation5 + $0xe8c] ss:$16 sps:$4 sm:$0xff]  }
 0x1f1   :  { %3467 = vmatpush1.bf16.msra.mxu0 %v5510_v48  ;;  %3795 = vmatpush1.bf16.msra.mxu1 %v5513_v49  ;;  %v5600_v48 = vld [vmem:[#allocation5 + $0xe80] ss:$16 sps:$4 sm:$0xff]   ;;  %v5603_v49 = vld [vmem:[#allocation5 + $0xe88] ss:$16 sps:$4 sm:$0xff]  }
 0x1f2   :  { %3468 = vmatprep.subr.bf16.mxu0 %v5518_v50  ;;  %3796 = vmatprep.subr.bf16.mxu1 %v5521_v51  ;;  %v5608_v50 = vld [vmem:[#allocation5 + $0xea4] ss:$16 sps:$4 sm:$0xff]   ;;  %v5611_v51 = vld [vmem:[#allocation5 + $0xeac] ss:$16 sps:$4 sm:$0xff]  }
 0x1f5   :  { %3469 = vmatpush1.bf16.msra.mxu0 %v5516_v52  ;;  %3797 = vmatpush1.bf16.msra.mxu1 %v5519_v53  ;;  %v5606_v52 = vld [vmem:[#allocation5 + $0xea0] ss:$16 sps:$4 sm:$0xff]   ;;  %v5609_v53 = vld [vmem:[#allocation5 + $0xea8] ss:$16 sps:$4 sm:$0xff]  }
 0x1f6   :  { %3470 = vmatprep.subr.bf16.mxu0 %v5524_v54  ;;  %3798 = vmatprep.subr.bf16.mxu1 %v5527_v55  ;;  %v5614_v54 = vld [vmem:[#allocation5 + $0xec4] ss:$16 sps:$4 sm:$0xff]   ;;  %v5617_v55 = vld [vmem:[#allocation5 + $0xecc] ss:$16 sps:$4 sm:$0xff]  }
 0x1f9   :  { %3471 = vmatpush1.bf16.msra.mxu0 %v5522_v56  ;;  %3799 = vmatpush1.bf16.msra.mxu1 %v5525_v57  ;;  %v5612_v56 = vld [vmem:[#allocation5 + $0xec0] ss:$16 sps:$4 sm:$0xff]   ;;  %v5615_v57 = vld [vmem:[#allocation5 + $0xec8] ss:$16 sps:$4 sm:$0xff]  }
 0x1fa   :  { %3472 = vmatprep.subr.bf16.mxu0 %v5530_v58  ;;  %3800 = vmatprep.subr.bf16.mxu1 %v5533_v59  ;;  %v5620_v58 = vld [vmem:[#allocation5 + $0xee4] ss:$16 sps:$4 sm:$0xff]   ;;  %v5623_v59 = vld [vmem:[#allocation5 + $0xeec] ss:$16 sps:$4 sm:$0xff]  }
 0x1fd   :  { %3473 = vmatpush1.bf16.msra.mxu0 %v5528_v60  ;;  %3801 = vmatpush1.bf16.msra.mxu1 %v5531_v61  ;;  %v5618_v60 = vld [vmem:[#allocation5 + $0xee0] ss:$16 sps:$4 sm:$0xff]   ;;  %v5621_v61 = vld [vmem:[#allocation5 + $0xee8] ss:$16 sps:$4 sm:$0xff]  }
 0x1fe   :  { %3474 = vmatprep.subr.bf16.mxu0 %v5536_v62  ;;  %3802 = vmatprep.subr.bf16.mxu1 %v5539_v63  ;;  %v5626_v62 = vld [vmem:[#allocation5 + $0xf04] ss:$16 sps:$4 sm:$0xff]   ;;  %v5629_v63 = vld [vmem:[#allocation5 + $0xf0c] ss:$16 sps:$4 sm:$0xff]  }
 0x201   :  { %3475 = vmatpush1.bf16.msra.mxu0 %v5534_v0  ;;  %3803 = vmatpush1.bf16.msra.mxu1 %v5537_v1  ;;  %v5624_v0 = vld [vmem:[#allocation5 + $0xf00] ss:$16 sps:$4 sm:$0xff]   ;;  %v5627_v1 = vld [vmem:[#allocation5 + $0xf08] ss:$16 sps:$4 sm:$0xff]  }
 0x202   :  { %3476 = vmatprep.subr.bf16.mxu0 %v5542_v2  ;;  %3804 = vmatprep.subr.bf16.mxu1 %v5545_v3  ;;  %v5632_v2 = vld [vmem:[#allocation5 + $0xf24] ss:$16 sps:$4 sm:$0xff]   ;;  %v5635_v3 = vld [vmem:[#allocation5 + $0xf2c] ss:$16 sps:$4 sm:$0xff]  }
 0x205   :  { %3477 = vmatpush1.bf16.msra.mxu0 %v5540_v4  ;;  %3805 = vmatpush1.bf16.msra.mxu1 %v5543_v5  ;;  %v5630_v4 = vld [vmem:[#allocation5 + $0xf20] ss:$16 sps:$4 sm:$0xff]   ;;  %v5633_v5 = vld [vmem:[#allocation5 + $0xf28] ss:$16 sps:$4 sm:$0xff]  }
 0x206   :  { %3478 = vmatprep.subr.bf16.mxu0 %v5548_v6  ;;  %3806 = vmatprep.subr.bf16.mxu1 %v5551_v7  ;;  %v5638_v6 = vld [vmem:[#allocation5 + $0xf44] ss:$16 sps:$4 sm:$0xff]   ;;  %v5641_v7 = vld [vmem:[#allocation5 + $0xf4c] ss:$16 sps:$4 sm:$0xff]  }
 0x209   :  { %3479 = vmatpush1.bf16.msra.mxu0 %v5546_v8  ;;  %3807 = vmatpush1.bf16.msra.mxu1 %v5549_v9  ;;  %v5636_v8 = vld [vmem:[#allocation5 + $0xf40] ss:$16 sps:$4 sm:$0xff]   ;;  %v5639_v9 = vld [vmem:[#allocation5 + $0xf48] ss:$16 sps:$4 sm:$0xff]  }
 0x20a   :  { %3480 = vmatprep.subr.bf16.mxu0 %v5554_v10  ;;  %3808 = vmatprep.subr.bf16.mxu1 %v5557_v11  ;;  %v5644_v10 = vld [vmem:[#allocation5 + $0xf64] ss:$16 sps:$4 sm:$0xff]   ;;  %v5647_v11 = vld [vmem:[#allocation5 + $0xf6c] ss:$16 sps:$4 sm:$0xff]  }
 0x20d   :  { %3481 = vmatpush1.bf16.msra.mxu0 %v5552_v12  ;;  %3809 = vmatpush1.bf16.msra.mxu1 %v5555_v13  ;;  %v5642_v12 = vld [vmem:[#allocation5 + $0xf60] ss:$16 sps:$4 sm:$0xff]   ;;  %v5645_v13 = vld [vmem:[#allocation5 + $0xf68] ss:$16 sps:$4 sm:$0xff]  }
 0x20e   :  { %3482 = vmatprep.subr.bf16.mxu0 %v5560_v14  ;;  %3810 = vmatprep.subr.bf16.mxu1 %v5563_v15  ;;  %v5650_v14 = vld [vmem:[#allocation5 + $0xf84] ss:$16 sps:$4 sm:$0xff]   ;;  %v5653_v15 = vld [vmem:[#allocation5 + $0xf8c] ss:$16 sps:$4 sm:$0xff]  }
 0x211   :  { %3483 = vmatpush1.bf16.msra.mxu0 %v5558_v16  ;;  %3811 = vmatpush1.bf16.msra.mxu1 %v5561_v17  ;;  %v5648_v16 = vld [vmem:[#allocation5 + $0xf80] ss:$16 sps:$4 sm:$0xff]   ;;  %v5651_v17 = vld [vmem:[#allocation5 + $0xf88] ss:$16 sps:$4 sm:$0xff]  }
 0x212   :  { %3484 = vmatprep.subr.bf16.mxu0 %v5566_v18  ;;  %3812 = vmatprep.subr.bf16.mxu1 %v5569_v19  ;;  %v5656_v18 = vld [vmem:[#allocation5 + $0xfa4] ss:$16 sps:$4 sm:$0xff]   ;;  %v5659_v19 = vld [vmem:[#allocation5 + $0xfac] ss:$16 sps:$4 sm:$0xff]  }
 0x215   :  { %3485 = vmatpush1.bf16.msra.mxu0 %v5564_v20  ;;  %3813 = vmatpush1.bf16.msra.mxu1 %v5567_v21  ;;  %v5654_v20 = vld [vmem:[#allocation5 + $0xfa0] ss:$16 sps:$4 sm:$0xff]   ;;  %v5657_v21 = vld [vmem:[#allocation5 + $0xfa8] ss:$16 sps:$4 sm:$0xff]  }
 0x216   :  { %3486 = vmatprep.subr.bf16.mxu0 %v5572_v22  ;;  %3814 = vmatprep.subr.bf16.mxu1 %v5575_v23  ;;  %v5662_v22 = vld [vmem:[#allocation5 + $0xfc4] ss:$16 sps:$4 sm:$0xff]   ;;  %v5665_v23 = vld [vmem:[#allocation5 + $0xfcc] ss:$16 sps:$4 sm:$0xff]  }
 0x219   :  { %3487 = vmatpush1.bf16.msra.mxu0 %v5570_v24  ;;  %3815 = vmatpush1.bf16.msra.mxu1 %v5573_v25  ;;  %v5660_v24 = vld [vmem:[#allocation5 + $0xfc0] ss:$16 sps:$4 sm:$0xff]   ;;  %v5663_v25 = vld [vmem:[#allocation5 + $0xfc8] ss:$16 sps:$4 sm:$0xff]  }
 0x21a   :  { %3497 = vmatprep.subr.bf16.mxu0 %v5578_v27  ;;  %3825 = vmatprep.subr.bf16.mxu1 %v5581_v28  ;;  %v5671_v27 = vld [vmem:[#allocation5 + $0xfec] ss:$16 sps:$4 sm:$0xff]   ;;  %v5666_v28 = vld [vmem:[#allocation5 + $0xfe0] ss:$16 sps:$4 sm:$0xff]  }
 0x21c   :  { %3489 = vmatmul.mubr.bf16.vlgmr.msra.gmra.mrb[0].mxu0 %v112_v29  ;;  %3817 = vmatmul.mubr.bf16.vlgmr.msra.gmra.mrb[0].mxu1 %v112_v29  ;;  %v5669_v29 = vld [vmem:[#allocation5 + $0xfe8] ss:$16 sps:$4 sm:$0xff]  }
 0x21d   :  { %3498 = vmatpush1.bf16.msra.mxu0 %v5576_v31  ;;  %3826 = vmatpush1.bf16.msra.mxu1 %v5579_v32  ;;  %v5672_v31 = vld [vmem:[#allocation8 + $0x40] sm:$0xff]  }
 0x21e   :  { %3499 = vmatprep.subr.bf16.mxu0 %v5584_v33  ;;  %3827 = vmatprep.subr.bf16.mxu1 %v5587_v34  ;;  %v5673_v32 = vld [vmem:[#allocation8 + $0xc0] sm:$0xff]   ;;  %v114_v33 = vpack.c.bf16 %v98_v30, %v98_v30 }
 0x21f   :  { %3529 = vmatprep.mubr.bf16.mxu0 %v115_v35  ;;  %3857 = vmatprep.mubr.bf16.mxu1 %v115_v35  ;;  %v5674_v34 = vld [vmem:[#allocation8] sm:$0xff]  }
 0x220   :  { %v5675_v35 = vld [vmem:[#allocation8 + $0x80] sm:$0xff]  }
 0x221   :  { %3500 = vmatpush1.bf16.msra.mxu0 %v5582_v36  ;;  %3828 = vmatpush1.bf16.msra.mxu1 %v5585_v37  ;;  %v5676_v36 = vld [vmem:[#allocation8 + $0x48] sm:$0xff]  }
 0x222   :  { %3501 = vmatprep.subr.bf16.mxu0 %v5590_v38  ;;  %3829 = vmatprep.subr.bf16.mxu1 %v5593_v39  ;;  %v5677_v37 = vld [vmem:[#allocation8 + $0xc8] sm:$0xff]  }
 0x223   :  { %v5678_v38 = vld [vmem:[#allocation8 + $0x8] sm:$0xff]  }
 0x224   :  { %v5679_v39 = vld [vmem:[#allocation8 + $0x88] sm:$0xff]  }
 0x225   :  { %3502 = vmatpush1.bf16.msra.mxu0 %v5588_v40  ;;  %3830 = vmatpush1.bf16.msra.mxu1 %v5591_v41  ;;  %v5680_v40 = vld [vmem:[#allocation8 + $0x50] sm:$0xff]  }
 0x226   :  { %3503 = vmatprep.subr.bf16.mxu0 %v5596_v42  ;;  %3831 = vmatprep.subr.bf16.mxu1 %v5599_v43  ;;  %v5681_v41 = vld [vmem:[#allocation8 + $0xd0] sm:$0xff]  }
 0x227   :  { %v5682_v42 = vld [vmem:[#allocation8 + $0x10] sm:$0xff]  }
 0x228   :  { %v5683_v43 = vld [vmem:[#allocation8 + $0x90] sm:$0xff]  }
 0x229   :  { %3504 = vmatpush1.bf16.msra.mxu0 %v5594_v44  ;;  %3832 = vmatpush1.bf16.msra.mxu1 %v5597_v45  ;;  %v5684_v44 = vld [vmem:[#allocation8 + $0x58] sm:$0xff]  }
 0x22a   :  { %3505 = vmatprep.subr.bf16.mxu0 %v5602_v46  ;;  %3833 = vmatprep.subr.bf16.mxu1 %v5605_v47  ;;  %v5685_v45 = vld [vmem:[#allocation8 + $0xd8] sm:$0xff]  }
 0x22b   :  { %v5686_v46 = vld [vmem:[#allocation8 + $0x18] sm:$0xff]  }
 0x22c   :  { %v5687_v47 = vld [vmem:[#allocation8 + $0x98] sm:$0xff]  }
 0x22d   :  { %3506 = vmatpush1.bf16.msra.mxu0 %v5600_v48  ;;  %3834 = vmatpush1.bf16.msra.mxu1 %v5603_v49  ;;  %v5688_v48 = vld [vmem:[#allocation8 + $0x60] sm:$0xff]  }
 0x22e   :  { %3507 = vmatprep.subr.bf16.mxu0 %v5608_v50  ;;  %3835 = vmatprep.subr.bf16.mxu1 %v5611_v51  ;;  %v5689_v49 = vld [vmem:[#allocation8 + $0xe0] sm:$0xff]  }
 0x22f   :  { %v5690_v50 = vld [vmem:[#allocation8 + $0x20] sm:$0xff]  }
 0x230   :  { %v5691_v51 = vld [vmem:[#allocation8 + $0xa0] sm:$0xff]  }
 0x231   :  { %3508 = vmatpush1.bf16.msra.mxu0 %v5606_v52  ;;  %3836 = vmatpush1.bf16.msra.mxu1 %v5609_v53  ;;  %v5692_v52 = vld [vmem:[#allocation8 + $0x68] sm:$0xff]  }
 0x232   :  { %3509 = vmatprep.subr.bf16.mxu0 %v5614_v54  ;;  %3837 = vmatprep.subr.bf16.mxu1 %v5617_v55  ;;  %v5693_v53 = vld [vmem:[#allocation8 + $0xe8] sm:$0xff]  }
 0x233   :  { %v5694_v54 = vld [vmem:[#allocation8 + $0x28] sm:$0xff]  }
 0x234   :  { %v5695_v55 = vld [vmem:[#allocation8 + $0xa8] sm:$0xff]  }
 0x235   :  { %3510 = vmatpush1.bf16.msra.mxu0 %v5612_v56  ;;  %3838 = vmatpush1.bf16.msra.mxu1 %v5615_v57  ;;  %v5696_v56 = vld [vmem:[#allocation8 + $0x70] sm:$0xff]  }
 0x236   :  { %3511 = vmatprep.subr.bf16.mxu0 %v5620_v58  ;;  %3839 = vmatprep.subr.bf16.mxu1 %v5623_v59  ;;  %v5697_v57 = vld [vmem:[#allocation8 + $0xf0] sm:$0xff]  }
 0x237   :  { %v5698_v58 = vld [vmem:[#allocation8 + $0x30] sm:$0xff]  }
 0x238   :  { %v5699_v59 = vld [vmem:[#allocation8 + $0xb0] sm:$0xff]  }
 0x239   :  { %3512 = vmatpush1.bf16.msra.mxu0 %v5618_v60  ;;  %3840 = vmatpush1.bf16.msra.mxu1 %v5621_v61  ;;  %v5700_v60 = vld [vmem:[#allocation8 + $0x78] sm:$0xff]  }
 0x23a   :  { %3513 = vmatprep.subr.bf16.mxu0 %v5626_v62  ;;  %3841 = vmatprep.subr.bf16.mxu1 %v5629_v63  ;;  %v5701_v61 = vld [vmem:[#allocation8 + $0xf8] sm:$0xff]  }
 0x23b   :  { %v5702_v62 = vld [vmem:[#allocation8 + $0x38] sm:$0xff]  }
 0x23c   :  { %v5703_v63 = vld [vmem:[#allocation8 + $0xb8] sm:$0xff]  }
 0x23d   :  { %3514 = vmatpush1.bf16.msra.mxu0 %v5624_v0  ;;  %3842 = vmatpush1.bf16.msra.mxu1 %v5627_v1  ;;  %v630_v0 = vlaneseq }
 0x23e   :  { %3515 = vmatprep.subr.bf16.mxu0 %v5632_v2  ;;  %3843 = vmatprep.subr.bf16.mxu1 %v5635_v3 }
 0x23f   :  { %v631_v1 = vshrl.u32 %v630_v0, 7 }
 0x241   :  { %3516 = vmatpush1.bf16.msra.mxu0 %v5630_v4  ;;  %3844 = vmatpush1.bf16.msra.mxu1 %v5633_v5  ;;  %v632_v2 = vsub.s32 0, %v631_v1  ;;  %v640_v3 = vsub.s32 2, %v631_v1  ;;  %v628_v4 = vld [vmem:[#allocation7] sm:$0xf]  ;;  %v636_v5 = vsub.s32 1, %v631_v1 }
 0x242   :  { %3517 = vmatprep.subr.bf16.mxu0 %v5638_v6  ;;  %3845 = vmatprep.subr.bf16.mxu1 %v5641_v7  ;;  %v644_v6 = vsub.s32 3, %v631_v1 }
 0x243   :  { %v633_v7 = vrot.slane %v628_v4, %v632_v2 }
 0x245   :  { %3518 = vmatpush1.bf16.msra.mxu0 %v5636_v8  ;;  %3846 = vmatpush1.bf16.msra.mxu1 %v5639_v9  ;;  %v641_v8 = vrot.slane %v628_v4, %v640_v3  ;;  %v637_v9 = vrot.slane %v628_v4, %v636_v5 }
 0x246   :  { %3519 = vmatprep.subr.bf16.mxu0 %v5644_v10  ;;  %3847 = vmatprep.subr.bf16.mxu1 %v5647_v11  ;;  %v645_v10 = vrot.slane %v628_v4, %v644_v6 }
 0x249   :  { %3520 = vmatpush1.bf16.msra.mxu0 %v5642_v12  ;;  %3848 = vmatpush1.bf16.msra.mxu1 %v5645_v13 }
 0x24a   :  { %3521 = vmatprep.subr.bf16.mxu0 %v5650_v14  ;;  %3849 = vmatprep.subr.bf16.mxu1 %v5653_v15 }
 0x24d   :  { %3522 = vmatpush1.bf16.msra.mxu0 %v5648_v16  ;;  %3850 = vmatpush1.bf16.msra.mxu1 %v5651_v17 }
 0x24e   :  { %3523 = vmatprep.subr.bf16.mxu0 %v5656_v18  ;;  %3851 = vmatprep.subr.bf16.mxu1 %v5659_v19 }
 0x251   :  { %3524 = vmatpush1.bf16.msra.mxu0 %v5654_v20  ;;  %3852 = vmatpush1.bf16.msra.mxu1 %v5657_v21 }
 0x252   :  { %3525 = vmatprep.subr.bf16.mxu0 %v5662_v22  ;;  %3853 = vmatprep.subr.bf16.mxu1 %v5665_v23 }
 0x255   :  { %3526 = vmatpush1.bf16.msra.mxu0 %v5660_v24  ;;  %3854 = vmatpush1.bf16.msra.mxu1 %v5663_v25 }
 0x256   :  { %3527 = vmatprep.subr.bf16.mxu0 %v5668_v26  ;;  %3855 = vmatprep.subr.bf16.mxu1 %v5671_v27 }
 0x259   :  { %3528 = vmatpush1.bf16.msra.mxu0 %v5666_v28  ;;  %3856 = vmatpush1.bf16.msra.mxu1 %v5669_v29 }
 0x25a   :  { %4790 = vmatprep.subr.bf16.mxu0 %v5672_v31  ;;  %4812 = vmatprep.subr.bf16.mxu1 %v5673_v32 }
 0x25c   :  { %3530 = vmatmul.mubr.bf16.vlgmr.msra.gmra.mrb[0].mxu0 %v114_v33  ;;  %3858 = vmatmul.mubr.bf16.vlgmr.msra.gmra.mrb[0].mxu1 %v114_v33  ;;  %v4757_v33 = vld [vmem:[#allocation10] ss:$0 sm:$0xff] }
 0x25d   :  { %4791 = vmatpush3.bf16.msra.mxu0 %v5674_v34  ;;  %4813 = vmatpush3.bf16.msra.mxu1 %v5675_v35 }
 0x25e   :  { %4792 = vmatprep.subr.bf16.mxu0 %v5676_v36  ;;  %4814 = vmatprep.subr.bf16.mxu1 %v5677_v37 }
 0x261   :  { %4793 = vmatpush3.bf16.msra.mxu0 %v5678_v38  ;;  %4815 = vmatpush3.bf16.msra.mxu1 %v5679_v39 }
 0x262   :  { %4794 = vmatprep.subr.bf16.mxu0 %v5680_v40  ;;  %4816 = vmatprep.subr.bf16.mxu1 %v5681_v41 }
 0x265   :  { %4795 = vmatpush3.bf16.msra.mxu0 %v5682_v42  ;;  %4817 = vmatpush3.bf16.msra.mxu1 %v5683_v43 }
 0x266   :  { %4796 = vmatprep.subr.bf16.mxu0 %v5684_v44  ;;  %4818 = vmatprep.subr.bf16.mxu1 %v5685_v45 }
 0x269   :  { %4797 = vmatpush3.bf16.msra.mxu0 %v5686_v46  ;;  %4819 = vmatpush3.bf16.msra.mxu1 %v5687_v47 }
 0x26a   :  { %4798 = vmatprep.subr.bf16.mxu0 %v5688_v48  ;;  %4820 = vmatprep.subr.bf16.mxu1 %v5689_v49 }
 0x26d   :  { %4799 = vmatpush3.bf16.msra.mxu0 %v5690_v50  ;;  %4821 = vmatpush3.bf16.msra.mxu1 %v5691_v51 }
 0x26e   :  { %4800 = vmatprep.subr.bf16.mxu0 %v5692_v52  ;;  %4822 = vmatprep.subr.bf16.mxu1 %v5693_v53 }
 0x271   :  { %4801 = vmatpush3.bf16.msra.mxu0 %v5694_v54  ;;  %4823 = vmatpush3.bf16.msra.mxu1 %v5695_v55 }
 0x272   :  { %4802 = vmatprep.subr.bf16.mxu0 %v5696_v56  ;;  %4824 = vmatprep.subr.bf16.mxu1 %v5697_v57 }
 0x275   :  { %4803 = vmatpush3.bf16.msra.mxu0 %v5698_v58  ;;  %4825 = vmatpush3.bf16.msra.mxu1 %v5699_v59 }
 0x276   :  { %4804 = vmatprep.subr.bf16.mxu0 %v5700_v60  ;;  %4826 = vmatprep.subr.bf16.mxu1 %v5701_v61 }
 0x279   :  { %4805 = vmatpush3.bf16.msra.mxu0 %v5702_v62  ;;  %4827 = vmatpush3.bf16.msra.mxu1 %v5703_v63 }
 0x32f   :  { %v3531_v11 = vpop.f32.mrb[0].mxu0  ;;  %v3859_v12 = vpop.f32.mrb[0].mxu1 }
 0x330   :  { %v4834_v13 = vadd.f32 %v3531_v11, %v633_v7  ;;  %v4836_v14 = vadd.f32 %v3859_v12, %v641_v8  ;;  %v3533_v15 = vpop.f32.mrb[1].mxu0  ;;  %v3861_v16 = vpop.f32.mrb[1].mxu1 }
 0x331   :  { %v4835_v17 = vadd.f32 %v3533_v15, %v637_v9  ;;  %v4837_v18 = vadd.f32 %v3861_v16, %v645_v10  ;;  %v3535_v19 = vpop.f32.mrb[2].mxu0  ;;  %v3863_v20 = vpop.f32.mrb[2].mxu1 }
 0x332   :  { %v3866_v21 = vmax.f32 %v4834_v13, 0.0  ;;  %v3868_v22 = vmax.f32 %v4836_v14, 0.0  ;;  %v3536_v23 = vpop.f32.mrb[3].mxu0  ;;  %v3864_v24 = vpop.f32.mrb[3].mxu1 }
 0x333   :  { %v3867_v25 = vmax.f32 %v4835_v17, 0.0  ;;  %v3869_v26 = vmax.f32 %v4837_v18, 0.0 }
 0x334   :  { %v3870_v29 = vpack.c.bf16 %v3866_v21, %v3866_v21  ;;  %v3872_v30 = vpack.c.bf16 %v3868_v22, %v3868_v22 }
 0x335   :  { %v3871_v27 = vpack.c.bf16 %v3867_v25, %v3867_v25  ;;  %v3873_v28 = vpack.c.bf16 %v3869_v26, %v3869_v26 }
 0x337   :  { %4169 = vmatprep.mubr.bf16.mxu0 %v3871_v27  ;;  %4209 = vmatprep.mubr.bf16.mxu1 %v3873_v28 }
 0x338   :  { %4170 = vmatmul.mubr.bf16.vlgmr.msra.gmra.mrb[4].mxu0 %v3870_v29  ;;  %4210 = vmatmul.mubr.bf16.vlgmr.msra.gmra.mrb[4].mxu1 %v3872_v30 }
 0x40b   :  { %v4806_v31 = vpop.f32.mrb[4].mxu0  ;;  %v4828_v32 = vpop.f32.mrb[4].mxu1 }
 0x40c   :  { %v4807_v34 = vpop.f32.mrb[5].mxu0  ;;  %v4829_v35 = vpop.f32.mrb[5].mxu1 }
 0x40d   :  { %v4808_v36 = vadd.f32 %v4807_v34, %v4806_v31  ;;  %v4830_v37 = vadd.f32 %v4829_v35, %v4828_v32  ;;  %v4809_v38 = vpop.f32.mrb[6].mxu0  ;;  %v4831_v39 = vpop.f32.mrb[6].mxu1 }
 0x40e   :  { %v4810_v40 = vpop.f32.mrb[7].mxu0  ;;  %v4832_v41 = vpop.f32.mrb[7].mxu1 }
 0x40f   :  { %v4172_v42 = vadd.f32 %v4808_v36, %v4757_v33 }
 0x411   :  { %v4212_v43 = vadd.f32 %v4830_v37, %v4172_v42 }
 0x413   :  { %4217 = vmax.xlane.f32.xlu0 %v4212_v43 }
 0x4a0   :  { %v4218_v44 = vpop.xlane.xlu0 %4217 }
 0x4a1   :  { %v4219_v45 = vsub.f32 %v4212_v43, %v4218_v44 }
 0x4a3   :  { %v4220_v46 = vmul.f32 1.442695, %v4219_v45 }
 0x4a5   :  { %5704 = vpow2.f32 %v4220_v46 }
 0x4af   :  { %v5705_v47 = vpop.eup %5704 }
 0x4b0   :  { %4222 = vadd.xlane.f32.xlu0 %v5705_v47 }
 0x53d   :  { %v4223_v48 = vpop.xlane.xlu0 %4222 }
 0x53e   :  { %5706 = vlog2.f32 %v4223_v48 }
 0x548   :  { %v5707_v49 = vpop.eup %5706 }
 0x549   :  { %v4225_v50 = vmul.f32 0.6931472, %v5707_v49 }
 0x54b   :  { %v4226_v51 = vsub.f32 %v4219_v45, %v4225_v50 }
 0x54d   :  { %4227 = vst [vmem:[#allocation11] sm:$0xff] %v4226_v51 }
 0x54e   :  { %5829 = shalt.err (!%p5826_p2)
}
 0x54f   :  { %s5830_s6 = scalar_lea.hbm %s5965_s5, 128 }
 0x550   :  { %p5831_p3 = scmp.ne.s32.totalorder %s5965_s5, %s5830_s6  ;;  %p5834_p4 = scmp.lt.u32.totalorder %s5830_s6, %s5965_s5 }
 0x552   :  { %p5836_p5 = pnand %p5834_p4, %p5831_p3 }
 0x554   :  { %5839 = shalt.err (!%p5836_p5)
}
 0x555   :  { %4237 = dma.vmem_to_hbm [thread:$0]  %s4235_s28, 128, %s5965_s5, [#allocation4]  }
 0x556   :  { %5846 = dma.done.wait [#allocation4], 128  }
 0x557   :  { %5847 = vsyncadd [#allocation4], 4294967168 }
 0x558   :  { %4241 = vsyncpa [#allocation3], 1 }
 0x559   :  { %4242 = vsyncpa [#allocation6], 1 }
 0x55a   :  { %4243 = vsyncpa [#allocation9], 1 }
 0x55b   :  { %4244 = vsyncpa [#allocation4], 1 }

</bundles_post_ra>
